<compile_context>
chip_gen: v7x
topology: tpu7x:2x2x1
jax: 0.10.0
libtpu: 0.0.40
codegen_flags: <defaults>
</compile_context>

<pallas_src>
import jax
import jax.numpy as jnp
from jax import lax
from jax.experimental import pallas as pl
from jax.experimental.pallas import tpu as pltpu

HIDDEN = 768
COS_EPS = 1e-8                    # torch.nn.CosineSimilarity default eps
NORM_EPS_SQ = COS_EPS * COS_EPS   # clamp applied to the squared norm


def _align_head_kernel(x_ref, w_ref, b_ref, emb_ref):
    # x_ref  : (R, D) f32  stacked [src_cls; tgt_cls] (rows padded to mult. of 8)
    # w_ref  : (D, D) f32  dense weight, (in, out) layout  -> y = x @ W + b
    # b_ref  : (1, D) f32  dense bias
    # emb_ref: (R, D) f32  L2-normalized tanh(x @ W + b)
    h = jnp.dot(x_ref[...], w_ref[...],
                preferred_element_type=jnp.float32) + b_ref[...]
    h = jnp.tanh(h)
    # L2 normalization: rsqrt on the EUP slot + multiply on the VPU.
    # eps^2 clamp keeps a degenerate all-zero row finite.
    inv = lax.rsqrt(
        jnp.maximum(jnp.sum(h * h, axis=-1, keepdims=True), NORM_EPS_SQ))
    emb_ref[...] = h * inv


def r2d2_align_head(src_cls, tgt_cls, w, b):
    """Alignment head: MLP(768->768)+tanh, L2-normalize, cosine similarity.

    src_cls, tgt_cls : (B, D) float32 CLS hidden states
    w                : (D, D) float32 dense weight laid out (in, out)
    b                : (D,)   float32 dense bias
    Returns (cos_sim (B,), emb1 (B, D), emb2 (B, D)).
    """
    B, D = src_cls.shape
    # Fuse the two MLP applications into one (2B, D) operand.  Pad rows to a
    # multiple of 8 so the f32 sublane tile is fully used (no-op for B=4).
    x = jnp.concatenate([src_cls, tgt_cls], axis=0)
    rows = 2 * B
    pad = (-rows) % 8
    if pad:
        x = jnp.pad(x, ((0, pad), (0, 0)))
    rows_p = rows + pad
    b2 = b.reshape(1, D).astype(jnp.float32)

    full2d = lambda shape: pl.BlockSpec(shape, lambda: (0, 0))

    emb = pl.pallas_call(
        _align_head_kernel,
        grid=(),
        out_shape=jax.ShapeDtypeStruct((rows_p, D), jnp.float32),
        in_specs=[
            full2d((rows_p, D)),  # stacked CLS activations (f32)
            full2d((D, D)),       # W (f32) — dominant DMA, streamed once
            full2d((1, D)),       # bias (f32)
        ],
        out_specs=full2d((rows_p, D)),   # single lane-dense output slab
        compiler_params=pltpu.CompilerParams(vmem_limit_bytes=16 << 20),
    )(x, w, b2)

    emb1 = emb[:B]
    emb2 = emb[B:2 * B]

    # Cosine similarity + MSE are a handful of lane-sparse scalars; they are
    # cheap XLA glue on the kernel's lane-dense output instead of width-1
    # masked VMEM stores inside the kernel.  den == 1 up to fp rounding
    # (inputs are unit-norm) but is kept for exact nn.CosineSimilarity
    # semantics; it fuses into the same tiny XLA fusion.
    num = jnp.sum(emb1 * emb2, axis=-1)
    den = jnp.maximum(
        jnp.linalg.norm(emb1, axis=-1) * jnp.linalg.norm(emb2, axis=-1),
        COS_EPS)
    cos = num / den
    return cos, emb1, emb2


def r2d2_for_align_forward(src_hidden, tgt_hidden, labels, w, b):
    """Mirrors R2D2ForAlign.train_forward, given backbone hidden states."""
    # CLS token extraction; fuses with the concatenate feeding the kernel.
    src_cls = src_hidden[:, 0, :]
    tgt_cls = tgt_hidden[:, 0, :]
    cos, emb1, emb2 = r2d2_align_head(src_cls, tgt_cls, w, b)
    labels_f = labels.astype(jnp.float32)
    loss = jnp.mean((cos - labels_f) ** 2)   # F.mse_loss(cos_sim, labels.float())
    return {
        "loss": loss,
        "logits": cos,
        "embeddings_1": emb1,
        "embeddings_2": emb2,
        "labels": labels,
    }


if __name__ == "__main__":
    key = jax.random.PRNGKey(0)
    k_src, k_tgt, k_w, k_b, k_lab = jax.random.split(key, 5)

    B, S, D = 4, 8, HIDDEN

    # deterministic "backbone" hidden states and head parameters
    src_hidden = jax.random.normal(k_src, (B, S, D), dtype=jnp.float32)
    tgt_hidden = jax.random.normal(k_tgt, (B, S, D), dtype=jnp.float32)
    # nn.Linear(768, 768)-shaped params (stored as (in, out) for y = x @ W + b)
    w = jax.random.normal(k_w, (D, D), dtype=jnp.float32) * 0.02
    b = jax.random.normal(k_b, (D,), dtype=jnp.float32) * 0.02
    labels = jax.random.randint(k_lab, (B,), 0, 2, dtype=jnp.int32)

    fwd = jax.jit(r2d2_for_align_forward)
    out = fwd(src_hidden, tgt_hidden, labels, w, b)
    jax.block_until_ready(out)

    # Reference in plain JAX (f32 end-to-end, matching the PyTorch module).
    def ref(src_hidden, tgt_hidden, labels, w, b):
        def head(x):
            h = jnp.tanh(x[:, 0, :] @ w + b)
            return h / jnp.linalg.norm(h, axis=-1, keepdims=True)

        s, t = head(src_hidden), head(tgt_hidden)
        num = jnp.sum(s * t, axis=-1)
        den = jnp.maximum(
            jnp.linalg.norm(s, axis=-1) * jnp.linalg.norm(t, axis=-1), COS_EPS)
        cos = num / den
        loss = jnp.mean((cos - labels.astype(jnp.float32)) ** 2)
        return loss, cos, s, t

    r_loss, r_cos, r_s, r_t = ref(src_hidden, tgt_hidden, labels, w, b)
    assert jnp.allclose(out["logits"], r_cos, atol=1e-4), "cos mismatch"
    assert jnp.allclose(out["embeddings_1"], r_s, atol=1e-4), "emb1 mismatch"
    assert jnp.allclose(out["embeddings_2"], r_t, atol=1e-4), "emb2 mismatch"
    assert jnp.allclose(out["loss"], r_loss, atol=1e-4), "loss mismatch"

    print("KERNEL_OK")
</pallas_src>

<mosaic_0001>
module attributes {stable_mosaic.version = 11 : i64} {
  func.func @_align_head_kernel(%arg0: memref<8x768xf32, #tpu.memory_space<vmem>>, %arg1: memref<768x768xf32, #tpu.memory_space<vmem>>, %arg2: memref<1x768xf32, #tpu.memory_space<vmem>>, %arg3: memref<8x768xf32, #tpu.memory_space<vmem>>) attributes {dimension_semantics = [], scalar_prefetch = 0 : i64, scratch_operands = 0 : i64, tpu.core_type = #tpu.core_type<tc>} {
    %c0 = arith.constant 0 : index
    %c0_0 = arith.constant 0 : index
    %0 = vector.load %arg0[%c0, %c0_0] : memref<8x768xf32, #tpu.memory_space<vmem>>, vector<8x768xf32>
    %c0_1 = arith.constant 0 : index
    %c0_2 = arith.constant 0 : index
    %1 = vector.load %arg1[%c0_1, %c0_2] : memref<768x768xf32, #tpu.memory_space<vmem>>, vector<768x768xf32>
    %cst = arith.constant dense<0.000000e+00> : vector<8x768xf32>
    %2 = tpu.matmul %0, %1, %cst {dimension_numbers = #tpu.dot_dimension_numbers<[1], [0], [0], [1], [0, 0, 1, 1], [], []>} : vector<8x768xf32>, vector<768x768xf32>, vector<8x768xf32> -> vector<8x768xf32>
    %c0_3 = arith.constant 0 : index
    %c0_4 = arith.constant 0 : index
    %3 = vector.load %arg2[%c0_3, %c0_4] : memref<1x768xf32, #tpu.memory_space<vmem>>, vector<1x768xf32>
    %4 = vector.broadcast %3 : vector<1x768xf32> to vector<8x768xf32>
    %5 = arith.addf %2, %4 : vector<8x768xf32>
    %6 = math.tanh %5 : vector<8x768xf32>
    %7 = arith.mulf %6, %6 : vector<8x768xf32>
    %cst_5 = arith.constant dense<0.000000e+00> : vector<8xf32>
    %8 = vector.multi_reduction <add>, %7, %cst_5 [1] : vector<8x768xf32> to vector<8xf32>
    %9 = vector.shape_cast %8 : vector<8xf32> to vector<8x1xf32>
    %cst_6 = arith.constant 1.000000e-16 : f32
    %10 = vector.broadcast %cst_6 : f32 to vector<8x1xf32>
    %11 = arith.maximumf %9, %10 : vector<8x1xf32>
    %12 = math.rsqrt %11 : vector<8x1xf32>
    %13 = vector.broadcast %12 : vector<8x1xf32> to vector<8x768xf32>
    %14 = arith.mulf %6, %13 : vector<8x768xf32>
    %c0_7 = arith.constant 0 : index
    %c0_8 = arith.constant 0 : index
    %15 = vector.load %arg3[%c0_7, %c0_8] : memref<8x768xf32, #tpu.memory_space<vmem>>, vector<8x768xf32>
    tpu.vector_store %arg3[%c0_7, %c0_8], %14 {strides = array<i32>} : memref<8x768xf32, #tpu.memory_space<vmem>>, vector<8x768xf32>,
    return
  }
}

</mosaic_0001>

<bundles_post_ra>
// kernel: r2d2_for_align_forward.1
= control target key start
LH: loop header
LB: loop body
LE: loop exit
PB: predicated region body
PF: predicated region fallthrough
CT: control target
= control target key end

     0   :  { %8 = vsyncpa [#allocation3], 0  ;;  %s1959_s12 = smov [#allocation2]   ;;  %s2079_s0 = inlined_call_operand.vmem [shape: f32[8,768], index: 0, kind: input, shape index: {}]   ;;  %s2080_s1 = inlined_call_operand.hbm [shape: f32[768,768], index: 1, kind: input, shape index: {}]   ;;  %s2081_s2 = inlined_call_operand.vmem [shape: f32[1,768], index: 2, kind: input, shape index: {}]   ;;  %s2082_s3 = inlined_call_operand.vmem [shape: f32[8,768], index: 3, kind: output, shape index: {}]  }
   0x1   :  { %s16_s13 = sshll.u32 %s1959_s12, 4  ;;  %s1935_s16 = scalar_lea.hbm %s2080_s1, 73728  ;;  %s17_s13 = int_to_ptr.vmem [resolvable:$true] %s16_s13 }
   0x2   :  { %p1936_p0 = scmp.ne.s32.totalorder %s2080_s1, %s1935_s16  ;;  %p1939_p1 = scmp.lt.u32.totalorder %s1935_s16, %s2080_s1 }
   0x4   :  { %p1941_p2 = pnand %p1939_p1, %p1936_p0 }
   0x6   :  { %1944 = shalt.err (!%p1941_p2)
}
   0x7   :  { %s1945_s21 = scalar_lea.vmem %s17_s13, 73728  ;;  %p1950_p4 = scmp.lt.s32.totalorder %s17_s13, %s17_s13 }
   0x8   :  { %p1946_p3 = scmp.ne.s32.totalorder %s17_s13, %s1945_s21  ;;  %p1951_p5 = scmp.lt.s32.totalorder %s1945_s21, %s1945_s21 }
   0xa   :  { %p1952_p6 = por %p1951_p5, %p1950_p4 }
   0xc   :  { %p1953_p7 = pnand %p1952_p6, %p1946_p3 }
   0xe   :  { %1956 = shalt.err (!%p1953_p7)
}
   0xf   :  { %s1960_s22 = smov 768   ;;  %s1961_s23 = smov 48  }
  0x10   :  { %22 = dma.hbm_to_vmem [thread:$0]  %s2080_s1, 73728, %s17_s13, [#allocation3], %s1960_s22, %s1960_s22, %s1961_s23  }
  0x11   :  { %1957 = dma.done.wait [#allocation3], 73728  }
  0x12   :  { %1958 = vsyncadd [#allocation3], 4294893568  ;;  %v35_v0 = vld [vmem:[#allocation2 + $0x8] sm:$0xff]  ;;  %v41_v1 = vld [vmem:[#allocation2 + $0x38] sm:$0xff] }
  0x13   :  { %v227_v2 = vld [vmem:[#allocation2 + $0x608] sm:$0xff]  ;;  %v1319_v3 = vpack.c.bf16 %v41_v1, %v35_v0  ;;  %v233_v4 = vld [vmem:[#allocation2 + $0x638] sm:$0xff]  ;;  %v34_v5 = vld [vmem:[#allocation2] sm:$0xff] }
  0x14   :  { %v40_v6 = vld [vmem:[#allocation2 + $0x30] sm:$0xff]  ;;  %v1383_v7 = vpack.c.bf16 %v233_v4, %v227_v2  ;;  %v226_v9 = vld [vmem:[#allocation2 + $0x600] sm:$0xff]  ;;  %v47_v11 = vld [vmem:[#allocation2 + $0x68] sm:$0xff] }
  0x15   :  { %v1321_v8 = vpack.c.bf16 %v40_v6, %v34_v5  ;;  %v232_v10 = vld [vmem:[#allocation2 + $0x630] sm:$0xff]  ;;  %1320 = vmatprep.subr.bf16.mxu1 %v1319_v3  ;;  %v53_v13 = vld [vmem:[#allocation2 + $0x98] sm:$0xff]  ;;  %v239_v14 = vld [vmem:[#allocation2 + $0x668] sm:$0xff] }
  0x16   :  { %v1385_v12 = vpack.c.bf16 %v232_v10, %v226_v9  ;;  %v245_v15 = vld [vmem:[#allocation2 + $0x698] sm:$0xff]  ;;  %1384 = vmatprep.subr.bf16.mxu0 %v1383_v7  ;;  %v1323_v16 = vpack.c.bf16 %v53_v13, %v47_v11  ;;  %v46_v18 = vld [vmem:[#allocation2 + $0x60] sm:$0xff]  ;;  %v52_v19 = vld [vmem:[#allocation2 + $0x90] sm:$0xff] }
  0x17   :  { %1322 = vmatpush1.bf16.msra.mxu1 %v1321_v8  ;;  %v1387_v17 = vpack.c.bf16 %v245_v15, %v239_v14  ;;  %v238_v20 = vld [vmem:[#allocation2 + $0x660] sm:$0xff]  ;;  %v1325_v21 = vpack.c.bf16 %v52_v19, %v46_v18  ;;  %v244_v22 = vld [vmem:[#allocation2 + $0x690] sm:$0xff]  ;;  %v59_v23 = vld [vmem:[#allocation2 + $0xc8] sm:$0xff] }
  0x18   :  { %1386 = vmatpush1.bf16.msra.mxu0 %v1385_v12  ;;  %v65_v24 = vld [vmem:[#allocation2 + $0xf8] sm:$0xff]  ;;  %1324 = vmatprep.subr.bf16.mxu1 %v1323_v16  ;;  %v1389_v25 = vpack.c.bf16 %v244_v22, %v238_v20  ;;  %v251_v27 = vld [vmem:[#allocation2 + $0x6c8] sm:$0xff]  ;;  %v58_v29 = vld [vmem:[#allocation2 + $0xc0] sm:$0xff] }
  0x19   :  { %1388 = vmatprep.subr.bf16.mxu0 %v1387_v17  ;;  %v1327_v26 = vpack.c.bf16 %v65_v24, %v59_v23  ;;  %v257_v28 = vld [vmem:[#allocation2 + $0x6f8] sm:$0xff]  ;;  %v64_v31 = vld [vmem:[#allocation2 + $0xf0] sm:$0xff]  ;;  %v250_v32 = vld [vmem:[#allocation2 + $0x6c0] sm:$0xff] }
  0x1a   :  { %v1391_v30 = vpack.c.bf16 %v257_v28, %v251_v27  ;;  %v256_v33 = vld [vmem:[#allocation2 + $0x6f0] sm:$0xff]  ;;  %v1329_v34 = vpack.c.bf16 %v64_v31, %v58_v29  ;;  %v71_v35 = vld [vmem:[#allocation2 + $0x128] sm:$0xff]  ;;  %v77_v36 = vld [vmem:[#allocation2 + $0x158] sm:$0xff] }
  0x1b   :  { %1326 = vmatpush1.bf16.msra.mxu1 %v1325_v21  ;;  %v263_v37 = vld [vmem:[#allocation2 + $0x728] sm:$0xff]  ;;  %v1393_v38 = vpack.c.bf16 %v256_v33, %v250_v32  ;;  %v1331_v39 = vpack.c.bf16 %v77_v36, %v71_v35  ;;  %v269_v40 = vld [vmem:[#allocation2 + $0x758] sm:$0xff]  ;;  %v70_v41 = vld [vmem:[#allocation2 + $0x120] sm:$0xff] }
  0x1c   :  { %1390 = vmatpush1.bf16.msra.mxu0 %v1389_v25  ;;  %1328 = vmatprep.subr.bf16.mxu1 %v1327_v26  ;;  %v76_v42 = vld [vmem:[#allocation2 + $0x150] sm:$0xff]  ;;  %v1395_v43 = vpack.c.bf16 %v269_v40, %v263_v37  ;;  %v262_v44 = vld [vmem:[#allocation2 + $0x720] sm:$0xff]  ;;  %v83_v46 = vld [vmem:[#allocation2 + $0x188] sm:$0xff] }
  0x1d   :  { %1392 = vmatprep.subr.bf16.mxu0 %v1391_v30  ;;  %v268_v45 = vld [vmem:[#allocation2 + $0x750] sm:$0xff]  ;;  %v89_v47 = vld [vmem:[#allocation2 + $0x1b8] sm:$0xff]  ;;  %v275_v48 = vld [vmem:[#allocation2 + $0x788] sm:$0xff]  ;;  %v1333_v50 = vpack.c.bf16 %v76_v42, %v70_v41 }
  0x1e   :  { %v281_v49 = vld [vmem:[#allocation2 + $0x7b8] sm:$0xff]  ;;  %v1397_v51 = vpack.c.bf16 %v268_v45, %v262_v44  ;;  %v1335_v52 = vpack.c.bf16 %v89_v47, %v83_v46  ;;  %v82_v53 = vld [vmem:[#allocation2 + $0x180] sm:$0xff]  ;;  %v88_v54 = vld [vmem:[#allocation2 + $0x1b0] sm:$0xff] }
  0x1f   :  { %1330 = vmatpush1.bf16.msra.mxu1 %v1329_v34  ;;  %v274_v55 = vld [vmem:[#allocation2 + $0x780] sm:$0xff]  ;;  %v1399_v56 = vpack.c.bf16 %v281_v49, %v275_v48  ;;  %v280_v57 = vld [vmem:[#allocation2 + $0x7b0] sm:$0xff]  ;;  %v95_v58 = vld [vmem:[#allocation2 + $0x1e8] sm:$0xff]  ;;  %v1337_v62 = vpack.c.bf16 %v88_v54, %v82_v53 }
  0x20   :  { %1394 = vmatpush1.bf16.msra.mxu0 %v1393_v38  ;;  %1332 = vmatprep.subr.bf16.mxu1 %v1331_v39  ;;  %v101_v59 = vld [vmem:[#allocation2 + $0x218] sm:$0xff]  ;;  %v287_v60 = vld [vmem:[#allocation2 + $0x7e8] sm:$0xff]  ;;  %v1401_v63 = vpack.c.bf16 %v280_v57, %v274_v55  ;;  %v94_v1 = vld [vmem:[#allocation2 + $0x1e0] sm:$0xff] }
  0x21   :  { %1396 = vmatprep.subr.bf16.mxu0 %v1395_v43  ;;  %v293_v61 = vld [vmem:[#allocation2 + $0x818] sm:$0xff]  ;;  %v1339_v0 = vpack.c.bf16 %v101_v59, %v95_v58  ;;  %v100_v2 = vld [vmem:[#allocation2 + $0x210] sm:$0xff]  ;;  %v286_v3 = vld [vmem:[#allocation2 + $0x7e0] sm:$0xff] }
  0x22   :  { %v1403_v4 = vpack.c.bf16 %v293_v61, %v287_v60  ;;  %v292_v5 = vld [vmem:[#allocation2 + $0x810] sm:$0xff]  ;;  %v107_v6 = vld [vmem:[#allocation2 + $0x248] sm:$0xff]  ;;  %v113_v7 = vld [vmem:[#allocation2 + $0x278] sm:$0xff]  ;;  %v1341_v10 = vpack.c.bf16 %v100_v2, %v94_v1 }
  0x23   :  { %1334 = vmatpush1.bf16.msra.mxu1 %v1333_v50  ;;  %v299_v8 = vld [vmem:[#allocation2 + $0x848] sm:$0xff]  ;;  %v305_v9 = vld [vmem:[#allocation2 + $0x878] sm:$0xff]  ;;  %v1405_v11 = vpack.c.bf16 %v292_v5, %v286_v3  ;;  %v1343_v12 = vpack.c.bf16 %v113_v7, %v107_v6  ;;  %v106_v13 = vld [vmem:[#allocation2 + $0x240] sm:$0xff] }
  0x24   :  { %1398 = vmatpush1.bf16.msra.mxu0 %v1397_v51  ;;  %1336 = vmatprep.subr.bf16.mxu1 %v1335_v52  ;;  %v112_v14 = vld [vmem:[#allocation2 + $0x270] sm:$0xff]  ;;  %v298_v15 = vld [vmem:[#allocation2 + $0x840] sm:$0xff]  ;;  %v1407_v16 = vpack.c.bf16 %v305_v9, %v299_v8  ;;  %v119_v18 = vld [vmem:[#allocation2 + $0x2a8] sm:$0xff] }
  0x25   :  { %1400 = vmatprep.subr.bf16.mxu0 %v1399_v56  ;;  %v304_v17 = vld [vmem:[#allocation2 + $0x870] sm:$0xff]  ;;  %v125_v19 = vld [vmem:[#allocation2 + $0x2d8] sm:$0xff]  ;;  %v311_v20 = vld [vmem:[#allocation2 + $0x8a8] sm:$0xff]  ;;  %v1345_v22 = vpack.c.bf16 %v112_v14, %v106_v13 }
  0x26   :  { %v317_v21 = vld [vmem:[#allocation2 + $0x8d8] sm:$0xff]  ;;  %v1409_v23 = vpack.c.bf16 %v304_v17, %v298_v15  ;;  %v1347_v24 = vpack.c.bf16 %v125_v19, %v119_v18  ;;  %v118_v25 = vld [vmem:[#allocation2 + $0x2a0] sm:$0xff]  ;;  %v124_v26 = vld [vmem:[#allocation2 + $0x2d0] sm:$0xff] }
  0x27   :  { %1338 = vmatpush1.bf16.msra.mxu1 %v1337_v62  ;;  %v310_v27 = vld [vmem:[#allocation2 + $0x8a0] sm:$0xff]  ;;  %v1411_v28 = vpack.c.bf16 %v317_v21, %v311_v20  ;;  %v316_v29 = vld [vmem:[#allocation2 + $0x8d0] sm:$0xff]  ;;  %v131_v30 = vld [vmem:[#allocation2 + $0x308] sm:$0xff]  ;;  %v1349_v34 = vpack.c.bf16 %v124_v26, %v118_v25 }
  0x28   :  { %1402 = vmatpush1.bf16.msra.mxu0 %v1401_v63  ;;  %1340 = vmatprep.subr.bf16.mxu1 %v1339_v0  ;;  %v137_v31 = vld [vmem:[#allocation2 + $0x338] sm:$0xff]  ;;  %v323_v32 = vld [vmem:[#allocation2 + $0x908] sm:$0xff]  ;;  %v1413_v35 = vpack.c.bf16 %v316_v29, %v310_v27  ;;  %v130_v37 = vld [vmem:[#allocation2 + $0x300] sm:$0xff] }
  0x29   :  { %1404 = vmatprep.subr.bf16.mxu0 %v1403_v4  ;;  %v329_v33 = vld [vmem:[#allocation2 + $0x938] sm:$0xff]  ;;  %v1351_v36 = vpack.c.bf16 %v137_v31, %v131_v30  ;;  %v136_v38 = vld [vmem:[#allocation2 + $0x330] sm:$0xff]  ;;  %v322_v39 = vld [vmem:[#allocation2 + $0x900] sm:$0xff] }
  0x2a   :  { %v1415_v40 = vpack.c.bf16 %v329_v33, %v323_v32  ;;  %v328_v41 = vld [vmem:[#allocation2 + $0x930] sm:$0xff]  ;;  %v143_v42 = vld [vmem:[#allocation2 + $0x368] sm:$0xff]  ;;  %v149_v43 = vld [vmem:[#allocation2 + $0x398] sm:$0xff]  ;;  %v1353_v46 = vpack.c.bf16 %v136_v38, %v130_v37 }
  0x2b   :  { %1342 = vmatpush1.bf16.msra.mxu1 %v1341_v10  ;;  %v335_v44 = vld [vmem:[#allocation2 + $0x968] sm:$0xff]  ;;  %v341_v45 = vld [vmem:[#allocation2 + $0x998] sm:$0xff]  ;;  %v1417_v47 = vpack.c.bf16 %v328_v41, %v322_v39  ;;  %v1355_v48 = vpack.c.bf16 %v149_v43, %v143_v42  ;;  %v142_v49 = vld [vmem:[#allocation2 + $0x360] sm:$0xff] }
  0x2c   :  { %1406 = vmatpush1.bf16.msra.mxu0 %v1405_v11  ;;  %1344 = vmatprep.subr.bf16.mxu1 %v1343_v12  ;;  %v148_v50 = vld [vmem:[#allocation2 + $0x390] sm:$0xff]  ;;  %v334_v51 = vld [vmem:[#allocation2 + $0x960] sm:$0xff]  ;;  %v1419_v52 = vpack.c.bf16 %v341_v45, %v335_v44  ;;  %v155_v54 = vld [vmem:[#allocation2 + $0x3c8] sm:$0xff] }
  0x2d   :  { %1408 = vmatprep.subr.bf16.mxu0 %v1407_v16  ;;  %v340_v53 = vld [vmem:[#allocation2 + $0x990] sm:$0xff]  ;;  %v161_v55 = vld [vmem:[#allocation2 + $0x3f8] sm:$0xff]  ;;  %v347_v56 = vld [vmem:[#allocation2 + $0x9c8] sm:$0xff]  ;;  %v1357_v58 = vpack.c.bf16 %v148_v50, %v142_v49 }
  0x2e   :  { %v353_v57 = vld [vmem:[#allocation2 + $0x9f8] sm:$0xff]  ;;  %v1421_v59 = vpack.c.bf16 %v340_v53, %v334_v51  ;;  %v1359_v60 = vpack.c.bf16 %v161_v55, %v155_v54  ;;  %v154_v61 = vld [vmem:[#allocation2 + $0x3c0] sm:$0xff]  ;;  %v160_v62 = vld [vmem:[#allocation2 + $0x3f0] sm:$0xff] }
  0x2f   :  { %1346 = vmatpush1.bf16.msra.mxu1 %v1345_v22  ;;  %v346_v63 = vld [vmem:[#allocation2 + $0x9c0] sm:$0xff]  ;;  %v1423_v0 = vpack.c.bf16 %v353_v57, %v347_v56  ;;  %v352_v1 = vld [vmem:[#allocation2 + $0x9f0] sm:$0xff]  ;;  %v167_v2 = vld [vmem:[#allocation2 + $0x428] sm:$0xff]  ;;  %v1361_v6 = vpack.c.bf16 %v160_v62, %v154_v61 }
  0x30   :  { %1410 = vmatpush1.bf16.msra.mxu0 %v1409_v23  ;;  %1348 = vmatprep.subr.bf16.mxu1 %v1347_v24  ;;  %v173_v3 = vld [vmem:[#allocation2 + $0x458] sm:$0xff]  ;;  %v359_v4 = vld [vmem:[#allocation2 + $0xa28] sm:$0xff]  ;;  %v166_v7 = vld [vmem:[#allocation2 + $0x420] sm:$0xff]  ;;  %v1425_v8 = vpack.c.bf16 %v352_v1, %v346_v63 }
  0x31   :  { %1412 = vmatprep.subr.bf16.mxu0 %v1411_v28  ;;  %v365_v5 = vld [vmem:[#allocation2 + $0xa58] sm:$0xff]  ;;  %v1363_v9 = vpack.c.bf16 %v173_v3, %v167_v2  ;;  %v172_v10 = vld [vmem:[#allocation2 + $0x450] sm:$0xff]  ;;  %v358_v11 = vld [vmem:[#allocation2 + $0xa20] sm:$0xff] }
  0x32   :  { %v364_v12 = vld [vmem:[#allocation2 + $0xa50] sm:$0xff]  ;;  %v1427_v13 = vpack.c.bf16 %v365_v5, %v359_v4  ;;  %v179_v14 = vld [vmem:[#allocation2 + $0x488] sm:$0xff]  ;;  %v185_v15 = vld [vmem:[#allocation2 + $0x4b8] sm:$0xff]  ;;  %v1365_v20 = vpack.c.bf16 %v172_v10, %v166_v7 }
  0x33   :  { %1350 = vmatpush1.bf16.msra.mxu1 %v1349_v34  ;;  %v1997_v16 = vld [vmem:[%s2079_s0 + $0x8] sm:$0xff]  ;;  %v377_v18 = vld [vmem:[#allocation2 + $0xab8] sm:$0xff]  ;;  %v1429_v21 = vpack.c.bf16 %v364_v12, %v358_v11  ;;  %v1367_v22 = vpack.c.bf16 %v185_v15, %v179_v14  ;;  %v178_v23 = vld [vmem:[#allocation2 + $0x480] sm:$0xff] }
  0x34   :  { %1414 = vmatpush1.bf16.msra.mxu0 %v1413_v35  ;;  %1352 = vmatprep.subr.bf16.mxu1 %v1351_v36  ;;  %v371_v17 = vld [vmem:[#allocation2 + $0xa88] sm:$0xff]  ;;  %v2003_v19 = vld [vmem:[%s2079_s0 + $0x18] sm:$0xff]  ;;  %v184_v24 = vld [vmem:[#allocation2 + $0x4b0] sm:$0xff] }
  0x35   :  { %1416 = vmatprep.subr.bf16.mxu0 %v1415_v40  ;;  %706 = vmatprep.mubr.f32.mxu1 %v1997_v16  ;;  %v370_v25 = vld [vmem:[#allocation2 + $0xa80] sm:$0xff]  ;;  %v1431_v26 = vpack.c.bf16 %v377_v18, %v371_v17  ;;  %v376_v27 = vld [vmem:[#allocation2 + $0xab0] sm:$0xff]  ;;  %v191_v28 = vld [vmem:[#allocation2 + $0x4e8] sm:$0xff]  ;;  %v1369_v32 = vpack.c.bf16 %v184_v24, %v178_v23 }
  0x36   :  { %777 = vmatprep.mubr.f32.mxu0 %v2003_v19  ;;  %v197_v29 = vld [vmem:[#allocation2 + $0x518] sm:$0xff]  ;;  %v383_v30 = vld [vmem:[#allocation2 + $0xae8] sm:$0xff]  ;;  %v1433_v33 = vpack.c.bf16 %v376_v27, %v370_v25  ;;  %v190_v35 = vld [vmem:[#allocation2 + $0x4e0] sm:$0xff] }
  0x37   :  { %1354 = vmatpush1.bf16.msra.mxu1 %v1353_v46  ;;  %v389_v31 = vld [vmem:[#allocation2 + $0xb18] sm:$0xff]  ;;  %v1371_v34 = vpack.c.bf16 %v197_v29, %v191_v28  ;;  %v196_v36 = vld [vmem:[#allocation2 + $0x510] sm:$0xff]  ;;  %v382_v37 = vld [vmem:[#allocation2 + $0xae0] sm:$0xff] }
  0x38   :  { %1418 = vmatpush1.bf16.msra.mxu0 %v1417_v47  ;;  %1356 = vmatprep.subr.bf16.mxu1 %v1355_v48  ;;  %v1435_v38 = vpack.c.bf16 %v389_v31, %v383_v30  ;;  %v388_v39 = vld [vmem:[#allocation2 + $0xb10] sm:$0xff]  ;;  %v203_v40 = vld [vmem:[#allocation2 + $0x548] sm:$0xff]  ;;  %v209_v41 = vld [vmem:[#allocation2 + $0x578] sm:$0xff]  ;;  %v1373_v44 = vpack.c.bf16 %v196_v36, %v190_v35 }
  0x39   :  { %1420 = vmatprep.subr.bf16.mxu0 %v1419_v52  ;;  %v395_v42 = vld [vmem:[#allocation2 + $0xb48] sm:$0xff]  ;;  %v401_v43 = vld [vmem:[#allocation2 + $0xb78] sm:$0xff]  ;;  %v1437_v45 = vpack.c.bf16 %v388_v39, %v382_v37  ;;  %v1375_v46 = vpack.c.bf16 %v209_v41, %v203_v40  ;;  %v202_v47 = vld [vmem:[#allocation2 + $0x540] sm:$0xff] }
  0x3a   :  { %v208_v48 = vld [vmem:[#allocation2 + $0x570] sm:$0xff]  ;;  %v394_v49 = vld [vmem:[#allocation2 + $0xb40] sm:$0xff]  ;;  %v1439_v50 = vpack.c.bf16 %v401_v43, %v395_v42  ;;  %v215_v52 = vld [vmem:[#allocation2 + $0x5a8] sm:$0xff] }
  0x3b   :  { %1358 = vmatpush1.bf16.msra.mxu1 %v1357_v58  ;;  %v400_v51 = vld [vmem:[#allocation2 + $0xb70] sm:$0xff]  ;;  %v221_v53 = vld [vmem:[#allocation2 + $0x5d8] sm:$0xff]  ;;  %v407_v54 = vld [vmem:[#allocation2 + $0xba8] sm:$0xff]  ;;  %v1377_v56 = vpack.c.bf16 %v208_v48, %v202_v47 }
  0x3c   :  { %1422 = vmatpush1.bf16.msra.mxu0 %v1421_v59  ;;  %1360 = vmatprep.subr.bf16.mxu1 %v1359_v60  ;;  %v413_v55 = vld [vmem:[#allocation2 + $0xbd8] sm:$0xff]  ;;  %v1441_v57 = vpack.c.bf16 %v400_v51, %v394_v49  ;;  %v1379_v58 = vpack.c.bf16 %v221_v53, %v215_v52  ;;  %v214_v59 = vld [vmem:[#allocation2 + $0x5a0] sm:$0xff]  ;;  %v220_v60 = vld [vmem:[#allocation2 + $0x5d0] sm:$0xff] }
  0x3d   :  { %1424 = vmatprep.subr.bf16.mxu0 %v1423_v0  ;;  %v406_v61 = vld [vmem:[#allocation2 + $0xba0] sm:$0xff]  ;;  %v1443_v62 = vpack.c.bf16 %v413_v55, %v407_v54  ;;  %v412_v63 = vld [vmem:[#allocation2 + $0xbd0] sm:$0xff]  ;;  %v37_v0 = vld [vmem:[#allocation2 + $0x18] sm:$0xff]  ;;  %v1381_v4 = vpack.c.bf16 %v220_v60, %v214_v59 }
  0x3e   :  { %v43_v1 = vld [vmem:[#allocation2 + $0x48] sm:$0xff]  ;;  %v425_v3 = vld [vmem:[#allocation2 + $0xc38] sm:$0xff]  ;;  %v1445_v5 = vpack.c.bf16 %v412_v63, %v406_v61  ;;  %v418_v7 = vld [vmem:[#allocation2 + $0xc00] sm:$0xff] }
  0x3f   :  { %1362 = vmatpush1.bf16.msra.mxu1 %v1361_v6  ;;  %v419_v2 = vld [vmem:[#allocation2 + $0xc08] sm:$0xff]  ;;  %v1511_v6 = vpack.c.bf16 %v43_v1, %v37_v0  ;;  %v424_v11 = vld [vmem:[#allocation2 + $0xc30] sm:$0xff]  ;;  %v49_v12 = vld [vmem:[#allocation2 + $0x78] sm:$0xff] }
  0x40   :  { %1426 = vmatpush1.bf16.msra.mxu0 %v1425_v8  ;;  %1364 = vmatprep.subr.bf16.mxu1 %v1363_v9  ;;  %v36_v8 = vld [vmem:[#allocation2 + $0x10] sm:$0xff]  ;;  %v42_v9 = vld [vmem:[#allocation2 + $0x40] sm:$0xff]  ;;  %v1447_v10 = vpack.c.bf16 %v425_v3, %v419_v2  ;;  %v431_v14 = vld [vmem:[#allocation2 + $0xc68] sm:$0xff] }
  0x41   :  { %1428 = vmatprep.subr.bf16.mxu0 %v1427_v13  ;;  %v55_v13 = vld [vmem:[#allocation2 + $0xa8] sm:$0xff]  ;;  %v437_v15 = vld [vmem:[#allocation2 + $0xc98] sm:$0xff]  ;;  %v2009_v17 = vld [vmem:[%s2079_s0] sm:$0xff] }
  0x42   :  { %v30_v18 = vld [vmem:[%s2079_s0 + $0x10] sm:$0xff]  ;;  %v430_v23 = vld [vmem:[#allocation2 + $0xc60] sm:$0xff]  ;;  %v61_v28 = vld [vmem:[#allocation2 + $0xd8] sm:$0xff] }
  0x43   :  { %1366 = vmatpush1.bf16.msra.mxu1 %v1365_v20  ;;  %v1513_v20 = vpack.c.bf16 %v42_v9, %v36_v8  ;;  %v48_v24 = vld [vmem:[#allocation2 + $0x70] sm:$0xff]  ;;  %v54_v25 = vld [vmem:[#allocation2 + $0xa0] sm:$0xff]  ;;  %v67_v29 = vld [vmem:[#allocation2 + $0x108] sm:$0xff] }
  0x44   :  { %1430 = vmatpush1.bf16.msra.mxu0 %v1429_v21  ;;  %1368 = vmatprep.subr.bf16.mxu1 %v1367_v22  ;;  %v1449_v21 = vpack.c.bf16 %v424_v11, %v418_v7  ;;  %v1515_v22 = vpack.c.bf16 %v55_v13, %v49_v12  ;;  %v436_v27 = vld [vmem:[#allocation2 + $0xc90] sm:$0xff]  ;;  %v443_v30 = vld [vmem:[#allocation2 + $0xcc8] sm:$0xff]  ;;  %v449_v31 = vld [vmem:[#allocation2 + $0xcf8] sm:$0xff] }
  0x45   :  { %1432 = vmatprep.subr.bf16.mxu0 %v1431_v26  ;;  %v1451_v26 = vpack.c.bf16 %v437_v15, %v431_v14  ;;  %v442_v35 = vld [vmem:[#allocation2 + $0xcc0] sm:$0xff]  ;;  %v60_v36 = vld [vmem:[#allocation2 + $0xd0] sm:$0xff]  ;;  %v73_v40 = vld [vmem:[#allocation2 + $0x138] sm:$0xff] }
  0x46   :  { %v66_v37 = vld [vmem:[#allocation2 + $0x100] sm:$0xff]  ;;  %v448_v39 = vld [vmem:[#allocation2 + $0xcf0] sm:$0xff]  ;;  %v79_v41 = vld [vmem:[#allocation2 + $0x168] sm:$0xff] }
  0x47   :  { %1370 = vmatpush1.bf16.msra.mxu1 %v1369_v32  ;;  %v1517_v32 = vpack.c.bf16 %v54_v25, %v48_v24  ;;  %v455_v42 = vld [vmem:[#allocation2 + $0xd28] sm:$0xff]  ;;  %v461_v43 = vld [vmem:[#allocation2 + $0xd58] sm:$0xff]  ;;  %v454_v47 = vld [vmem:[#allocation2 + $0xd20] sm:$0xff] }
  0x48   :  { %1434 = vmatpush1.bf16.msra.mxu0 %v1433_v33  ;;  %1372 = vmatprep.subr.bf16.mxu1 %v1371_v34  ;;  %v1453_v33 = vpack.c.bf16 %v436_v27, %v430_v23  ;;  %v1519_v34 = vpack.c.bf16 %v67_v29, %v61_v28  ;;  %v72_v48 = vld [vmem:[#allocation2 + $0x130] sm:$0xff]  ;;  %v78_v49 = vld [vmem:[#allocation2 + $0x160] sm:$0xff]  ;;  %v85_v52 = vld [vmem:[#allocation2 + $0x198] sm:$0xff] }
  0x49   :  { %1436 = vmatprep.subr.bf16.mxu0 %v1435_v38  ;;  %v1455_v38 = vpack.c.bf16 %v449_v31, %v443_v30  ;;  %v460_v51 = vld [vmem:[#allocation2 + $0xd50] sm:$0xff]  ;;  %v91_v53 = vld [vmem:[#allocation2 + $0x1c8] sm:$0xff]  ;;  %v473_v55 = vld [vmem:[#allocation2 + $0xdb8] sm:$0xff] }
  0x4a   :  { %v467_v54 = vld [vmem:[#allocation2 + $0xd88] sm:$0xff]  ;;  %v466_v59 = vld [vmem:[#allocation2 + $0xd80] sm:$0xff]  ;;  %v84_v60 = vld [vmem:[#allocation2 + $0x190] sm:$0xff] }
  0x4b   :  { %1374 = vmatpush1.bf16.msra.mxu1 %v1373_v44  ;;  %v1521_v44 = vpack.c.bf16 %v66_v37, %v60_v36  ;;  %v90_v61 = vld [vmem:[#allocation2 + $0x1c0] sm:$0xff]  ;;  %v472_v63 = vld [vmem:[#allocation2 + $0xdb0] sm:$0xff]  ;;  %v97_v0 = vld [vmem:[#allocation2 + $0x1f8] sm:$0xff] }
  0x4c   :  { %1438 = vmatpush1.bf16.msra.mxu0 %v1437_v45  ;;  %1376 = vmatprep.subr.bf16.mxu1 %v1375_v46  ;;  %v1457_v45 = vpack.c.bf16 %v448_v39, %v442_v35  ;;  %v1523_v46 = vpack.c.bf16 %v79_v41, %v73_v40  ;;  %v103_v1 = vld [vmem:[#allocation2 + $0x228] sm:$0xff]  ;;  %v485_v3 = vld [vmem:[#allocation2 + $0xe18] sm:$0xff]  ;;  %v478_v7 = vld [vmem:[#allocation2 + $0xde0] sm:$0xff] }
  0x4d   :  { %1440 = vmatprep.subr.bf16.mxu0 %v1439_v50  ;;  %v1459_v50 = vpack.c.bf16 %v461_v43, %v455_v42  ;;  %v479_v2 = vld [vmem:[#allocation2 + $0xde8] sm:$0xff]  ;;  %v96_v8 = vld [vmem:[#allocation2 + $0x1f0] sm:$0xff]  ;;  %v102_v9 = vld [vmem:[#allocation2 + $0x220] sm:$0xff] }
  0x4e   :  { %v484_v11 = vld [vmem:[#allocation2 + $0xe10] sm:$0xff]  ;;  %v109_v12 = vld [vmem:[#allocation2 + $0x258] sm:$0xff]  ;;  %v115_v13 = vld [vmem:[#allocation2 + $0x288] sm:$0xff] }
  0x4f   :  { %1378 = vmatpush1.bf16.msra.mxu1 %v1377_v56  ;;  %v1525_v56 = vpack.c.bf16 %v78_v49, %v72_v48  ;;  %v491_v14 = vld [vmem:[#allocation2 + $0xe48] sm:$0xff]  ;;  %v497_v15 = vld [vmem:[#allocation2 + $0xe78] sm:$0xff]  ;;  %v496_v23 = vld [vmem:[#allocation2 + $0xe70] sm:$0xff] }
  0x50   :  { %1442 = vmatpush1.bf16.msra.mxu0 %v1441_v57  ;;  %1380 = vmatprep.subr.bf16.mxu1 %v1379_v58  ;;  %v1461_v57 = vpack.c.bf16 %v460_v51, %v454_v47  ;;  %v1527_v58 = vpack.c.bf16 %v91_v53, %v85_v52  ;;  %v108_v24 = vld [vmem:[#allocation2 + $0x250] sm:$0xff]  ;;  %v114_v25 = vld [vmem:[#allocation2 + $0x280] sm:$0xff]  ;;  %v121_v27 = vld [vmem:[#allocation2 + $0x2b8] sm:$0xff] }
  0x51   :  { %1444 = vmatprep.subr.bf16.mxu0 %v1443_v62  ;;  %v1463_v62 = vpack.c.bf16 %v473_v55, %v467_v54  ;;  %v127_v28 = vld [vmem:[#allocation2 + $0x2e8] sm:$0xff]  ;;  %v509_v31 = vld [vmem:[#allocation2 + $0xed8] sm:$0xff]  ;;  %v502_v35 = vld [vmem:[#allocation2 + $0xea0] sm:$0xff] }
  0x52   :  { %v2019_v29 = vld [vmem:[%s2079_s0 + $0x28] sm:$0xff]  ;;  %v120_v36 = vld [vmem:[#allocation2 + $0x2b0] sm:$0xff]  ;;  %v126_v37 = vld [vmem:[#allocation2 + $0x2e0] sm:$0xff] }
  0x53   :  { %1382 = vmatpush1.bf16.msra.mxu1 %v1381_v4  ;;  %v1529_v4 = vpack.c.bf16 %v90_v61, %v84_v60  ;;  %v503_v30 = vld [vmem:[#allocation2 + $0xea8] sm:$0xff]  ;;  %v508_v39 = vld [vmem:[#allocation2 + $0xed0] sm:$0xff]  ;;  %v133_v40 = vld [vmem:[#allocation2 + $0x318] sm:$0xff] }
  0x54   :  { %1446 = vmatpush1.bf16.msra.mxu0 %v1445_v5  ;;  %1512 = vmatprep.subr.bf16.mxu1 %v1511_v6  ;;  %v1465_v5 = vpack.c.bf16 %v472_v63, %v466_v59  ;;  %v1531_v6 = vpack.c.bf16 %v103_v1, %v97_v0  ;;  %v139_v41 = vld [vmem:[#allocation2 + $0x348] sm:$0xff]  ;;  %v521_v43 = vld [vmem:[#allocation2 + $0xf38] sm:$0xff]  ;;  %v514_v47 = vld [vmem:[#allocation2 + $0xf00] sm:$0xff] }
  0x55   :  { %1448 = vmatprep.subr.bf16.mxu0 %v1447_v10  ;;  %v1467_v10 = vpack.c.bf16 %v485_v3, %v479_v2  ;;  %v515_v42 = vld [vmem:[#allocation2 + $0xf08] sm:$0xff]  ;;  %v132_v48 = vld [vmem:[#allocation2 + $0x310] sm:$0xff]  ;;  %v138_v49 = vld [vmem:[#allocation2 + $0x340] sm:$0xff] }
  0x56   :  { %707 = vmatmul.mubr.f32.vlgmr.msra.gmra.mrb[0].mxu1 %v2009_v17  ;;  %v520_v51 = vld [vmem:[#allocation2 + $0xf30] sm:$0xff]  ;;  %v145_v52 = vld [vmem:[#allocation2 + $0x378] sm:$0xff]  ;;  %v151_v53 = vld [vmem:[#allocation2 + $0x3a8] sm:$0xff] }
  0x57   :  { %778 = vmatmul.mubr.f32.vlgmr.msra.gmra.mrb[0].mxu0 %v30_v18  ;;  %1514 = vmatpush1.bf16.msra.mxu1 %v1513_v20  ;;  %v1533_v18 = vpack.c.bf16 %v102_v9, %v96_v8  ;;  %v490_v20 = vld [vmem:[#allocation2 + $0xe40] sm:$0xff]  ;;  %v527_v54 = vld [vmem:[#allocation2 + $0xf68] sm:$0xff]  ;;  %v533_v55 = vld [vmem:[#allocation2 + $0xf98] sm:$0xff] }
  0x58   :  { %1450 = vmatpush1.bf16.msra.mxu0 %v1449_v21  ;;  %1516 = vmatprep.subr.bf16.mxu1 %v1515_v22  ;;  %v1469_v21 = vpack.c.bf16 %v484_v11, %v478_v7  ;;  %v1535_v22 = vpack.c.bf16 %v115_v13, %v109_v12  ;;  %v526_v59 = vld [vmem:[#allocation2 + $0xf60] sm:$0xff]  ;;  %v144_v60 = vld [vmem:[#allocation2 + $0x370] sm:$0xff]  ;;  %v157_v0 = vld [vmem:[#allocation2 + $0x3d8] sm:$0xff] }
  0x59   :  { %1452 = vmatprep.subr.bf16.mxu0 %v1451_v26  ;;  %919 = vmatprep.mubr.f32.mxu1 %v1997_v16  ;;  %v1471_v26 = vpack.c.bf16 %v497_v15, %v491_v14  ;;  %v150_v61 = vld [vmem:[#allocation2 + $0x3a0] sm:$0xff]  ;;  %v532_v63 = vld [vmem:[#allocation2 + $0xf90] sm:$0xff]  ;;  %v163_v1 = vld [vmem:[#allocation2 + $0x408] sm:$0xff] }
  0x5a   :  { %848 = vmatprep.mubr.f32.mxu0 %v2019_v29  ;;  %v539_v2 = vld [vmem:[#allocation2 + $0xfc8] sm:$0xff]  ;;  %v545_v3 = vld [vmem:[#allocation2 + $0xff8] sm:$0xff]  ;;  %v538_v7 = vld [vmem:[#allocation2 + $0xfc0] sm:$0xff] }
  0x5b   :  { %1518 = vmatpush1.bf16.msra.mxu1 %v1517_v32  ;;  %v1537_v32 = vpack.c.bf16 %v114_v25, %v108_v24  ;;  %v156_v8 = vld [vmem:[#allocation2 + $0x3d0] sm:$0xff]  ;;  %v162_v9 = vld [vmem:[#allocation2 + $0x400] sm:$0xff]  ;;  %v169_v12 = vld [vmem:[#allocation2 + $0x438] sm:$0xff] }
  0x5c   :  { %1454 = vmatpush1.bf16.msra.mxu0 %v1453_v33  ;;  %1520 = vmatprep.subr.bf16.mxu1 %v1519_v34  ;;  %v1473_v33 = vpack.c.bf16 %v496_v23, %v490_v20  ;;  %v1539_v34 = vpack.c.bf16 %v127_v28, %v121_v27  ;;  %v544_v11 = vld [vmem:[#allocation2 + $0xff0] sm:$0xff]  ;;  %v175_v13 = vld [vmem:[#allocation2 + $0x468] sm:$0xff]  ;;  %v557_v15 = vld [vmem:[#allocation2 + $0x1058] sm:$0xff] }
  0x5d   :  { %1456 = vmatprep.subr.bf16.mxu0 %v1455_v38  ;;  %v1475_v38 = vpack.c.bf16 %v509_v31, %v503_v30  ;;  %v551_v14 = vld [vmem:[#allocation2 + $0x1028] sm:$0xff]  ;;  %v1489_v20 = vpack.c.bf16 %v544_v11, %v538_v7  ;;  %v168_v23 = vld [vmem:[#allocation2 + $0x430] sm:$0xff]  ;;  %v174_v24 = vld [vmem:[#allocation2 + $0x460] sm:$0xff] }
  0x5e   :  { %v1491_v25 = vpack.c.bf16 %v557_v15, %v551_v14  ;;  %v181_v27 = vld [vmem:[#allocation2 + $0x498] sm:$0xff]  ;;  %v187_v28 = vld [vmem:[#allocation2 + $0x4c8] sm:$0xff]  ;;  %v598_v7 = vld [vmem:[#allocation2 + $0x11a0] sm:$0xff] }
  0x5f   :  { %1522 = vmatpush1.bf16.msra.mxu1 %v1521_v44  ;;  %v1541_v44 = vpack.c.bf16 %v126_v37, %v120_v36  ;;  %v563_v30 = vld [vmem:[#allocation2 + $0x1088] sm:$0xff]  ;;  %v569_v31 = vld [vmem:[#allocation2 + $0x10b8] sm:$0xff]  ;;  %v180_v36 = vld [vmem:[#allocation2 + $0x490] sm:$0xff] }
  0x60   :  { %1458 = vmatpush1.bf16.msra.mxu0 %v1457_v45  ;;  %1524 = vmatprep.subr.bf16.mxu1 %v1523_v46  ;;  %v1477_v45 = vpack.c.bf16 %v508_v39, %v502_v35  ;;  %v1543_v46 = vpack.c.bf16 %v139_v41, %v133_v40  ;;  %v562_v35 = vld [vmem:[#allocation2 + $0x1080] sm:$0xff]  ;;  %v568_v39 = vld [vmem:[#allocation2 + $0x10b0] sm:$0xff]  ;;  %v193_v40 = vld [vmem:[#allocation2 + $0x4f8] sm:$0xff] }
  0x61   :  { %1460 = vmatprep.subr.bf16.mxu0 %v1459_v50  ;;  %v1479_v50 = vpack.c.bf16 %v521_v43, %v515_v42  ;;  %v186_v37 = vld [vmem:[#allocation2 + $0x4c0] sm:$0xff]  ;;  %v199_v41 = vld [vmem:[#allocation2 + $0x528] sm:$0xff]  ;;  %v581_v43 = vld [vmem:[#allocation2 + $0x1118] sm:$0xff] }
  0x62   :  { %v575_v42 = vld [vmem:[#allocation2 + $0x10e8] sm:$0xff]  ;;  %v604_v11 = vld [vmem:[#allocation2 + $0x11d0] sm:$0xff]  ;;  %v45_v15 = vld [vmem:[#allocation2 + $0x58] sm:$0xff] }
  0x63   :  { %1526 = vmatpush1.bf16.msra.mxu1 %v1525_v56  ;;  %v1545_v56 = vpack.c.bf16 %v138_v49, %v132_v48  ;;  %v192_v48 = vld [vmem:[#allocation2 + $0x4f0] sm:$0xff]  ;;  %v198_v49 = vld [vmem:[#allocation2 + $0x520] sm:$0xff]  ;;  %v39_v14 = vld [vmem:[#allocation2 + $0x28] sm:$0xff] }
  0x64   :  { %1462 = vmatpush1.bf16.msra.mxu0 %v1461_v57  ;;  %1528 = vmatprep.subr.bf16.mxu1 %v1527_v58  ;;  %v1481_v57 = vpack.c.bf16 %v520_v51, %v514_v47  ;;  %v1547_v58 = vpack.c.bf16 %v151_v53, %v145_v52  ;;  %v574_v47 = vld [vmem:[#allocation2 + $0x10e0] sm:$0xff]  ;;  %v580_v51 = vld [vmem:[#allocation2 + $0x1110] sm:$0xff]  ;;  %v205_v52 = vld [vmem:[#allocation2 + $0x558] sm:$0xff] }
  0x65   :  { %1464 = vmatprep.subr.bf16.mxu0 %v1463_v62  ;;  %v1483_v62 = vpack.c.bf16 %v533_v55, %v527_v54  ;;  %v211_v53 = vld [vmem:[#allocation2 + $0x588] sm:$0xff]  ;;  %v593_v55 = vld [vmem:[#allocation2 + $0x1178] sm:$0xff] }
  0x66   :  { %v587_v54 = vld [vmem:[#allocation2 + $0x1148] sm:$0xff] }
  0x67   :  { %1530 = vmatpush1.bf16.msra.mxu1 %v1529_v4  ;;  %v1549_v4 = vpack.c.bf16 %v150_v61, %v144_v60  ;;  %v204_v60 = vld [vmem:[#allocation2 + $0x550] sm:$0xff]  ;;  %v210_v61 = vld [vmem:[#allocation2 + $0x580] sm:$0xff] }
  0x68   :  { %1466 = vmatpush1.bf16.msra.mxu0 %v1465_v5  ;;  %1532 = vmatprep.subr.bf16.mxu1 %v1531_v6  ;;  %v1485_v5 = vpack.c.bf16 %v532_v63, %v526_v59  ;;  %v1551_v6 = vpack.c.bf16 %v163_v1, %v157_v0  ;;  %v586_v59 = vld [vmem:[#allocation2 + $0x1140] sm:$0xff]  ;;  %v592_v63 = vld [vmem:[#allocation2 + $0x1170] sm:$0xff]  ;;  %v217_v0 = vld [vmem:[#allocation2 + $0x5b8] sm:$0xff] }
  0x69   :  { %1468 = vmatprep.subr.bf16.mxu0 %v1467_v10  ;;  %v1487_v10 = vpack.c.bf16 %v545_v3, %v539_v2  ;;  %v223_v1 = vld [vmem:[#allocation2 + $0x5e8] sm:$0xff]  ;;  %v605_v3 = vld [vmem:[#allocation2 + $0x11d8] sm:$0xff] }
  0x6a   :  { %v599_v2 = vld [vmem:[#allocation2 + $0x11a8] sm:$0xff] }
  0x6b   :  { %1534 = vmatpush1.bf16.msra.mxu1 %v1533_v18  ;;  %v1553_v18 = vpack.c.bf16 %v162_v9, %v156_v8  ;;  %v216_v8 = vld [vmem:[#allocation2 + $0x5b0] sm:$0xff]  ;;  %v222_v9 = vld [vmem:[#allocation2 + $0x5e0] sm:$0xff] }
  0x6c   :  { %1470 = vmatpush1.bf16.msra.mxu0 %v1469_v21  ;;  %1536 = vmatprep.subr.bf16.mxu1 %v1535_v22  ;;  %v1555_v21 = vpack.c.bf16 %v175_v13, %v169_v12  ;;  %v550_v22 = vld [vmem:[#allocation2 + $0x1020] sm:$0xff]  ;;  %v229_v12 = vld [vmem:[#allocation2 + $0x618] sm:$0xff]  ;;  %v235_v13 = vld [vmem:[#allocation2 + $0x648] sm:$0xff] }
  0x6d   :  { %1472 = vmatprep.subr.bf16.mxu0 %v1471_v26  ;;  %v556_v26 = vld [vmem:[#allocation2 + $0x1050] sm:$0xff] }
  0x6f   :  { %1538 = vmatpush1.bf16.msra.mxu1 %v1537_v32  ;;  %v1557_v32 = vpack.c.bf16 %v174_v24, %v168_v23  ;;  %v234_v23 = vld [vmem:[#allocation2 + $0x640] sm:$0xff] }
  0x70   :  { %1474 = vmatpush1.bf16.msra.mxu0 %v1473_v33  ;;  %1540 = vmatprep.subr.bf16.mxu1 %v1539_v34  ;;  %v1493_v33 = vpack.c.bf16 %v556_v26, %v550_v22  ;;  %v1559_v34 = vpack.c.bf16 %v187_v28, %v181_v27  ;;  %v228_v22 = vld [vmem:[#allocation2 + $0x610] sm:$0xff]  ;;  %v38_v24 = vld [vmem:[#allocation2 + $0x20] sm:$0xff]  ;;  %v241_v27 = vld [vmem:[#allocation2 + $0x678] sm:$0xff] }
  0x71   :  { %1476 = vmatprep.subr.bf16.mxu0 %v1475_v38  ;;  %v1495_v38 = vpack.c.bf16 %v569_v31, %v563_v30  ;;  %v44_v26 = vld [vmem:[#allocation2 + $0x50] sm:$0xff]  ;;  %v247_v28 = vld [vmem:[#allocation2 + $0x6a8] sm:$0xff]  ;;  %v57_v31 = vld [vmem:[#allocation2 + $0xb8] sm:$0xff] }
  0x72   :  { %v51_v30 = vld [vmem:[#allocation2 + $0x88] sm:$0xff] }
  0x73   :  { %1542 = vmatpush1.bf16.msra.mxu1 %v1541_v44  ;;  %v1561_v44 = vpack.c.bf16 %v186_v37, %v180_v36  ;;  %v240_v36 = vld [vmem:[#allocation2 + $0x670] sm:$0xff]  ;;  %v246_v37 = vld [vmem:[#allocation2 + $0x6a0] sm:$0xff] }
  0x74   :  { %1478 = vmatpush1.bf16.msra.mxu0 %v1477_v45  ;;  %1544 = vmatprep.subr.bf16.mxu1 %v1543_v46  ;;  %v1497_v45 = vpack.c.bf16 %v568_v39, %v562_v35  ;;  %v1563_v46 = vpack.c.bf16 %v199_v41, %v193_v40  ;;  %v1579_v35 = vpack.c.bf16 %v247_v28, %v241_v27  ;;  %v56_v40 = vld [vmem:[#allocation2 + $0xb0] sm:$0xff]  ;;  %v253_v41 = vld [vmem:[#allocation2 + $0x6d8] sm:$0xff]  ;;  %v111_v27 = vld [vmem:[#allocation2 + $0x268] sm:$0xff] }
  0x75   :  { %1480 = vmatprep.subr.bf16.mxu0 %v1479_v50  ;;  %v1499_v50 = vpack.c.bf16 %v581_v43, %v575_v42  ;;  %v1707_v39 = vpack.c.bf16 %v57_v31, %v51_v30  ;;  %v259_v42 = vld [vmem:[#allocation2 + $0x708] sm:$0xff]  ;;  %v117_v28 = vld [vmem:[#allocation2 + $0x298] sm:$0xff] }
  0x76   :  { %v63_v43 = vld [vmem:[#allocation2 + $0xe8] sm:$0xff] }
  0x77   :  { %1546 = vmatpush1.bf16.msra.mxu1 %v1545_v56  ;;  %v1565_v56 = vpack.c.bf16 %v198_v49, %v192_v48  ;;  %v252_v48 = vld [vmem:[#allocation2 + $0x6d0] sm:$0xff]  ;;  %v258_v49 = vld [vmem:[#allocation2 + $0x700] sm:$0xff] }
  0x78   :  { %1482 = vmatpush1.bf16.msra.mxu0 %v1481_v57  ;;  %1548 = vmatprep.subr.bf16.mxu1 %v1547_v58  ;;  %v1501_v57 = vpack.c.bf16 %v580_v51, %v574_v47  ;;  %v1567_v58 = vpack.c.bf16 %v211_v53, %v205_v52  ;;  %v1583_v47 = vpack.c.bf16 %v259_v42, %v253_v41  ;;  %v68_v52 = vld [vmem:[#allocation2 + $0x110] sm:$0xff]  ;;  %v265_v53 = vld [vmem:[#allocation2 + $0x738] sm:$0xff] }
  0x79   :  { %1484 = vmatprep.subr.bf16.mxu0 %v1483_v62  ;;  %v1503_v62 = vpack.c.bf16 %v593_v55, %v587_v54  ;;  %v271_v54 = vld [vmem:[#allocation2 + $0x768] sm:$0xff]  ;;  %v81_v55 = vld [vmem:[#allocation2 + $0x178] sm:$0xff] }
  0x7a   :  { %v129_v41 = vld [vmem:[#allocation2 + $0x2f8] sm:$0xff] }
  0x7b   :  { %1550 = vmatpush1.bf16.msra.mxu1 %v1549_v4  ;;  %v1569_v4 = vpack.c.bf16 %v210_v61, %v204_v60  ;;  %v270_v60 = vld [vmem:[#allocation2 + $0x760] sm:$0xff] }
  0x7c   :  { %1486 = vmatpush1.bf16.msra.mxu0 %v1485_v5  ;;  %1552 = vmatprep.subr.bf16.mxu1 %v1551_v6  ;;  %v1505_v5 = vpack.c.bf16 %v592_v63, %v586_v59  ;;  %v1571_v6 = vpack.c.bf16 %v223_v1, %v217_v0  ;;  %v264_v59 = vld [vmem:[#allocation2 + $0x730] sm:$0xff]  ;;  %v74_v61 = vld [vmem:[#allocation2 + $0x140] sm:$0xff]  ;;  %v277_v0 = vld [vmem:[#allocation2 + $0x798] sm:$0xff] }
  0x7d   :  { %1488 = vmatprep.subr.bf16.mxu0 %v1487_v10  ;;  %v1507_v10 = vpack.c.bf16 %v605_v3, %v599_v2  ;;  %v80_v63 = vld [vmem:[#allocation2 + $0x170] sm:$0xff]  ;;  %v283_v1 = vld [vmem:[#allocation2 + $0x7c8] sm:$0xff]  ;;  %v1589_v3 = vpack.c.bf16 %v270_v60, %v264_v59 }
  0x7e   :  { %v87_v2 = vld [vmem:[#allocation2 + $0x1a8] sm:$0xff]  ;;  %v140_v60 = vld [vmem:[#allocation2 + $0x350] sm:$0xff] }
  0x7f   :  { %1554 = vmatpush1.bf16.msra.mxu1 %v1553_v18  ;;  %v1573_v18 = vpack.c.bf16 %v222_v9, %v216_v8  ;;  %v92_v9 = vld [vmem:[#allocation2 + $0x1d0] sm:$0xff] }
  0x80   :  { %1490 = vmatpush1.bf16.msra.mxu0 %v1489_v20  ;;  %1556 = vmatprep.subr.bf16.mxu1 %v1555_v21  ;;  %v1509_v20 = vpack.c.bf16 %v604_v11, %v598_v7  ;;  %v1575_v21 = vpack.c.bf16 %v235_v13, %v229_v12  ;;  %v86_v7 = vld [vmem:[#allocation2 + $0x1a0] sm:$0xff]  ;;  %v295_v11 = vld [vmem:[#allocation2 + $0x828] sm:$0xff]  ;;  %v105_v13 = vld [vmem:[#allocation2 + $0x238] sm:$0xff] }
  0x81   :  { %1492 = vmatprep.subr.bf16.mxu0 %v1491_v25  ;;  %v1703_v25 = vpack.c.bf16 %v45_v15, %v39_v14  ;;  %v99_v12 = vld [vmem:[#allocation2 + $0x208] sm:$0xff]  ;;  %v1721_v15 = vpack.c.bf16 %v92_v9, %v86_v7  ;;  %v349_v7 = vld [vmem:[#allocation2 + $0x9d8] sm:$0xff] }
  0x82   :  { %v159_v9 = vld [vmem:[#allocation2 + $0x3e8] sm:$0xff] }
  0x83   :  { %1558 = vmatpush1.bf16.msra.mxu1 %v1557_v32  ;;  %v32_v32 = vld [vmem:[%s2079_s0 + $0x20] sm:$0xff] }
  0x84   :  { %1494 = vmatpush1.bf16.msra.mxu0 %v1493_v33  ;;  %1560 = vmatprep.subr.bf16.mxu1 %v1559_v34  ;;  %v1577_v33 = vpack.c.bf16 %v234_v23, %v228_v22  ;;  %v1705_v34 = vpack.c.bf16 %v44_v26, %v38_v24  ;;  %v98_v22 = vld [vmem:[#allocation2 + $0x200] sm:$0xff]  ;;  %v1723_v23 = vpack.c.bf16 %v105_v13, %v99_v12  ;;  %v104_v24 = vld [vmem:[#allocation2 + $0x230] sm:$0xff]  ;;  %v307_v26 = vld [vmem:[#allocation2 + $0x888] sm:$0xff] }
  0x85   :  { %1496 = vmatprep.subr.bf16.mxu0 %v1495_v38  ;;  %v50_v38 = vld [vmem:[#allocation2 + $0x80] sm:$0xff]  ;;  %v1725_v31 = vpack.c.bf16 %v104_v24, %v98_v22  ;;  %v361_v22 = vld [vmem:[#allocation2 + $0xa38] sm:$0xff]  ;;  %v171_v24 = vld [vmem:[#allocation2 + $0x448] sm:$0xff] }
  0x87   :  { %1562 = vmatpush1.bf16.msra.mxu1 %v1561_v44  ;;  %v69_v44 = vld [vmem:[#allocation2 + $0x118] sm:$0xff] }
  0x88   :  { %1498 = vmatpush1.bf16.msra.mxu0 %v1497_v45  ;;  %1564 = vmatprep.subr.bf16.mxu1 %v1563_v46  ;;  %v1581_v45 = vpack.c.bf16 %v246_v37, %v240_v36  ;;  %v1709_v46 = vpack.c.bf16 %v56_v40, %v50_v38  ;;  %v1711_v51 = vpack.c.bf16 %v69_v44, %v63_v43  ;;  %v116_v37 = vld [vmem:[#allocation2 + $0x290] sm:$0xff]  ;;  %v313_v38 = vld [vmem:[#allocation2 + $0x8b8] sm:$0xff]  ;;  %v123_v40 = vld [vmem:[#allocation2 + $0x2c8] sm:$0xff] }
  0x89   :  { %1500 = vmatprep.subr.bf16.mxu0 %v1499_v50  ;;  %v62_v50 = vld [vmem:[#allocation2 + $0xe0] sm:$0xff]  ;;  %v1727_v36 = vpack.c.bf16 %v117_v28, %v111_v27 }
  0x8b   :  { %1566 = vmatpush1.bf16.msra.mxu1 %v1565_v56  ;;  %v1585_v56 = vpack.c.bf16 %v258_v49, %v252_v48  ;;  %v1731_v48 = vpack.c.bf16 %v129_v41, %v123_v40  ;;  %v128_v49 = vld [vmem:[#allocation2 + $0x2f0] sm:$0xff] }
  0x8c   :  { %1502 = vmatpush1.bf16.msra.mxu0 %v1501_v57  ;;  %1568 = vmatprep.subr.bf16.mxu1 %v1567_v58  ;;  %v1713_v57 = vpack.c.bf16 %v68_v52, %v62_v50  ;;  %v1587_v58 = vpack.c.bf16 %v271_v54, %v265_v53  ;;  %v325_v50 = vld [vmem:[#allocation2 + $0x918] sm:$0xff]  ;;  %v135_v52 = vld [vmem:[#allocation2 + $0x328] sm:$0xff] }
  0x8d   :  { %1504 = vmatprep.subr.bf16.mxu0 %v1503_v62  ;;  %v141_v53 = vld [vmem:[#allocation2 + $0x358] sm:$0xff] }
  0x8e   :  { %v1735_v59 = vpack.c.bf16 %v141_v53, %v135_v52 }
  0x8f   :  { %1570 = vmatpush1.bf16.msra.mxu1 %v1569_v4  ;;  %v1591_v4 = vpack.c.bf16 %v283_v1, %v277_v0  ;;  %v153_v0 = vld [vmem:[#allocation2 + $0x3b8] sm:$0xff] }
  0x90   :  { %1506 = vmatpush1.bf16.msra.mxu0 %v1505_v5  ;;  %1572 = vmatprep.subr.bf16.mxu1 %v1571_v6  ;;  %v276_v5 = vld [vmem:[#allocation2 + $0x790] sm:$0xff]  ;;  %v282_v6 = vld [vmem:[#allocation2 + $0x7c0] sm:$0xff] }
  0x91   :  { %1508 = vmatprep.subr.bf16.mxu0 %v1507_v10  ;;  %v289_v10 = vld [vmem:[#allocation2 + $0x7f8] sm:$0xff]  ;;  %v1593_v14 = vpack.c.bf16 %v282_v6, %v276_v5  ;;  %v152_v6 = vld [vmem:[#allocation2 + $0x3b0] sm:$0xff] }
  0x93   :  { %1574 = vmatpush1.bf16.msra.mxu1 %v1573_v18  ;;  %v1595_v18 = vpack.c.bf16 %v295_v11, %v289_v10  ;;  %v165_v10 = vld [vmem:[#allocation2 + $0x418] sm:$0xff] }
  0x94   :  { %1510 = vmatpush1.bf16.msra.mxu0 %v1509_v20  ;;  %1576 = vmatprep.subr.bf16.mxu1 %v1575_v21  ;;  %v288_v20 = vld [vmem:[#allocation2 + $0x7f0] sm:$0xff]  ;;  %v294_v21 = vld [vmem:[#allocation2 + $0x820] sm:$0xff] }
  0x95   :  { %1704 = vmatprep.subr.bf16.mxu0 %v1703_v25  ;;  %v301_v25 = vld [vmem:[#allocation2 + $0x858] sm:$0xff]  ;;  %v1597_v30 = vpack.c.bf16 %v294_v21, %v288_v20  ;;  %v1743_v20 = vpack.c.bf16 %v165_v10, %v159_v9  ;;  %v164_v21 = vld [vmem:[#allocation2 + $0x410] sm:$0xff] }
  0x96   :  { %920 = vmatmul.mubr.f32.vlgmr.msra.gmra.mrb[2].mxu1 %v2009_v17  ;;  %v75_v17 = vld [vmem:[#allocation2 + $0x148] sm:$0xff] }
  0x97   :  { %849 = vmatmul.mubr.f32.vlgmr.msra.gmra.mrb[0].mxu0 %v32_v32  ;;  %1578 = vmatpush1.bf16.msra.mxu1 %v1577_v33  ;;  %v1715_v62 = vpack.c.bf16 %v81_v55, %v75_v17  ;;  %v1599_v32 = vpack.c.bf16 %v307_v26, %v301_v25  ;;  %v300_v33 = vld [vmem:[#allocation2 + $0x850] sm:$0xff]  ;;  %v177_v25 = vld [vmem:[#allocation2 + $0x478] sm:$0xff] }
  0x98   :  { %1706 = vmatpush1.bf16.msra.mxu0 %v1705_v34  ;;  %1580 = vmatprep.subr.bf16.mxu1 %v1579_v35  ;;  %v306_v34 = vld [vmem:[#allocation2 + $0x880] sm:$0xff] }
  0x99   :  { %1708 = vmatprep.subr.bf16.mxu0 %v1707_v39  ;;  %990 = vmatprep.mubr.f32.mxu1 %v2003_v19  ;;  %v93_v19 = vld [vmem:[#allocation2 + $0x1d8] sm:$0xff]  ;;  %v110_v35 = vld [vmem:[#allocation2 + $0x260] sm:$0xff]  ;;  %v319_v39 = vld [vmem:[#allocation2 + $0x8e8] sm:$0xff]  ;;  %v1601_v42 = vpack.c.bf16 %v306_v34, %v300_v33  ;;  %v1747_v33 = vpack.c.bf16 %v177_v25, %v171_v24 }
  0x9a   :  { %1132 = vmatprep.mubr.f32.mxu0 %v1997_v16  ;;  %v1717_v16 = vpack.c.bf16 %v80_v63, %v74_v61  ;;  %v1719_v8 = vpack.c.bf16 %v93_v19, %v87_v2  ;;  %v1729_v43 = vpack.c.bf16 %v116_v37, %v110_v35  ;;  %v1603_v44 = vpack.c.bf16 %v319_v39, %v313_v38  ;;  %v337_v61 = vld [vmem:[#allocation2 + $0x978] sm:$0xff]  ;;  %v147_v63 = vld [vmem:[#allocation2 + $0x388] sm:$0xff]  ;;  %v176_v34 = vld [vmem:[#allocation2 + $0x470] sm:$0xff] }
  0x9b   :  { %1582 = vmatpush1.bf16.msra.mxu1 %v1581_v45  ;;  %v312_v45 = vld [vmem:[#allocation2 + $0x8b0] sm:$0xff]  ;;  %v1739_v5 = vpack.c.bf16 %v153_v0, %v147_v63  ;;  %v373_v35 = vld [vmem:[#allocation2 + $0xa98] sm:$0xff]  ;;  %v183_v37 = vld [vmem:[#allocation2 + $0x4a8] sm:$0xff] }
  0x9c   :  { %1710 = vmatpush1.bf16.msra.mxu0 %v1709_v46  ;;  %1584 = vmatprep.subr.bf16.mxu1 %v1583_v47  ;;  %v318_v46 = vld [vmem:[#allocation2 + $0x8e0] sm:$0xff]  ;;  %v189_v38 = vld [vmem:[#allocation2 + $0x4d8] sm:$0xff] }
  0x9d   :  { %1712 = vmatprep.subr.bf16.mxu0 %v1711_v51  ;;  %v122_v47 = vld [vmem:[#allocation2 + $0x2c0] sm:$0xff]  ;;  %v331_v51 = vld [vmem:[#allocation2 + $0x948] sm:$0xff]  ;;  %v1605_v54 = vpack.c.bf16 %v318_v46, %v312_v45  ;;  %v1751_v45 = vpack.c.bf16 %v189_v38, %v183_v37  ;;  %v188_v46 = vld [vmem:[#allocation2 + $0x4d0] sm:$0xff] }
  0x9e   :  { %v1733_v17 = vpack.c.bf16 %v128_v49, %v122_v47  ;;  %v1607_v55 = vpack.c.bf16 %v331_v51, %v325_v50  ;;  %v385_v47 = vld [vmem:[#allocation2 + $0xaf8] sm:$0xff]  ;;  %v195_v49 = vld [vmem:[#allocation2 + $0x508] sm:$0xff] }
  0x9f   :  { %1586 = vmatpush1.bf16.msra.mxu1 %v1585_v56  ;;  %v324_v56 = vld [vmem:[#allocation2 + $0x910] sm:$0xff]  ;;  %v201_v50 = vld [vmem:[#allocation2 + $0x538] sm:$0xff] }
  0xa0   :  { %1714 = vmatpush1.bf16.msra.mxu0 %v1713_v57  ;;  %1588 = vmatprep.subr.bf16.mxu1 %v1587_v58  ;;  %v330_v57 = vld [vmem:[#allocation2 + $0x940] sm:$0xff] }
  0xa1   :  { %1716 = vmatprep.subr.bf16.mxu0 %v1715_v62  ;;  %v134_v58 = vld [vmem:[#allocation2 + $0x320] sm:$0xff]  ;;  %v343_v62 = vld [vmem:[#allocation2 + $0x9a8] sm:$0xff]  ;;  %v1609_v1 = vpack.c.bf16 %v330_v57, %v324_v56  ;;  %v1755_v56 = vpack.c.bf16 %v201_v50, %v195_v49  ;;  %v200_v57 = vld [vmem:[#allocation2 + $0x530] sm:$0xff] }
  0xa2   :  { %v1737_v2 = vpack.c.bf16 %v140_v60, %v134_v58  ;;  %v1611_v19 = vpack.c.bf16 %v343_v62, %v337_v61  ;;  %v397_v58 = vld [vmem:[#allocation2 + $0xb58] sm:$0xff]  ;;  %v207_v60 = vld [vmem:[#allocation2 + $0x568] sm:$0xff]  ;;  %v1931_v49 = vld [vmem:[%s2079_s0] sm:$0xff] }
  0xa3   :  { %1590 = vmatpush1.bf16.msra.mxu1 %v1589_v3  ;;  %v336_v3 = vld [vmem:[#allocation2 + $0x970] sm:$0xff]  ;;  %v213_v61 = vld [vmem:[#allocation2 + $0x598] sm:$0xff] }
  0xa4   :  { %1718 = vmatpush1.bf16.msra.mxu0 %v1717_v16  ;;  %1592 = vmatprep.subr.bf16.mxu1 %v1591_v4  ;;  %v342_v16 = vld [vmem:[#allocation2 + $0x9a0] sm:$0xff] }
  0xa5   :  { %1720 = vmatprep.subr.bf16.mxu0 %v1719_v8  ;;  %v146_v4 = vld [vmem:[#allocation2 + $0x380] sm:$0xff]  ;;  %v355_v8 = vld [vmem:[#allocation2 + $0xa08] sm:$0xff]  ;;  %v1613_v11 = vpack.c.bf16 %v342_v16, %v336_v3  ;;  %v1759_v3 = vpack.c.bf16 %v213_v61, %v207_v60  ;;  %v212_v16 = vld [vmem:[#allocation2 + $0x590] sm:$0xff] }
  0xa6   :  { %v1741_v12 = vpack.c.bf16 %v152_v6, %v146_v4  ;;  %v1615_v13 = vpack.c.bf16 %v355_v8, %v349_v7  ;;  %v409_v4 = vld [vmem:[#allocation2 + $0xbb8] sm:$0xff]  ;;  %v219_v6 = vld [vmem:[#allocation2 + $0x5c8] sm:$0xff] }
  0xa7   :  { %1594 = vmatpush1.bf16.msra.mxu1 %v1593_v14  ;;  %v348_v14 = vld [vmem:[#allocation2 + $0x9d0] sm:$0xff]  ;;  %v225_v7 = vld [vmem:[#allocation2 + $0x5f8] sm:$0xff] }
  0xa8   :  { %1722 = vmatpush1.bf16.msra.mxu0 %v1721_v15  ;;  %1596 = vmatprep.subr.bf16.mxu1 %v1595_v18  ;;  %v354_v15 = vld [vmem:[#allocation2 + $0xa00] sm:$0xff]  ;;  %v273_v60 = vld [vmem:[#allocation2 + $0x778] sm:$0xff] }
  0xa9   :  { %1724 = vmatprep.subr.bf16.mxu0 %v1723_v23  ;;  %v158_v18 = vld [vmem:[#allocation2 + $0x3e0] sm:$0xff]  ;;  %v367_v23 = vld [vmem:[#allocation2 + $0xa68] sm:$0xff]  ;;  %v1617_v26 = vpack.c.bf16 %v354_v15, %v348_v14  ;;  %v1763_v14 = vpack.c.bf16 %v225_v7, %v219_v6  ;;  %v224_v15 = vld [vmem:[#allocation2 + $0x5f0] sm:$0xff] }
  0xaa   :  { %v1745_v27 = vpack.c.bf16 %v164_v21, %v158_v18  ;;  %v1619_v28 = vpack.c.bf16 %v367_v23, %v361_v22  ;;  %v421_v18 = vld [vmem:[#allocation2 + $0xc18] sm:$0xff]  ;;  %v231_v21 = vld [vmem:[#allocation2 + $0x628] sm:$0xff] }
  0xab   :  { %1598 = vmatpush1.bf16.msra.mxu1 %v1597_v30  ;;  %v360_v30 = vld [vmem:[#allocation2 + $0xa30] sm:$0xff]  ;;  %v237_v22 = vld [vmem:[#allocation2 + $0x658] sm:$0xff] }
  0xac   :  { %1726 = vmatpush1.bf16.msra.mxu0 %v1725_v31  ;;  %1600 = vmatprep.subr.bf16.mxu1 %v1599_v32  ;;  %v366_v31 = vld [vmem:[#allocation2 + $0xa60] sm:$0xff]  ;;  %v1932_v61 = vld [vmem:[%s2079_s0 + $0x18] sm:$0xff] }
  0xad   :  { %1728 = vmatprep.subr.bf16.mxu0 %v1727_v36  ;;  %v170_v32 = vld [vmem:[#allocation2 + $0x440] sm:$0xff]  ;;  %v379_v36 = vld [vmem:[#allocation2 + $0xac8] sm:$0xff]  ;;  %v1621_v39 = vpack.c.bf16 %v366_v31, %v360_v30  ;;  %v1767_v30 = vpack.c.bf16 %v237_v22, %v231_v21  ;;  %v236_v31 = vld [vmem:[#allocation2 + $0x650] sm:$0xff] }
  0xae   :  { %v1749_v40 = vpack.c.bf16 %v176_v34, %v170_v32  ;;  %v1623_v41 = vpack.c.bf16 %v379_v36, %v373_v35  ;;  %v433_v32 = vld [vmem:[#allocation2 + $0xc78] sm:$0xff]  ;;  %v243_v34 = vld [vmem:[#allocation2 + $0x688] sm:$0xff] }
  0xaf   :  { %1602 = vmatpush1.bf16.msra.mxu1 %v1601_v42  ;;  %v372_v42 = vld [vmem:[#allocation2 + $0xa90] sm:$0xff]  ;;  %v249_v35 = vld [vmem:[#allocation2 + $0x6b8] sm:$0xff] }
  0xb0   :  { %1730 = vmatpush1.bf16.msra.mxu0 %v1729_v43  ;;  %1604 = vmatprep.subr.bf16.mxu1 %v1603_v44  ;;  %v378_v43 = vld [vmem:[#allocation2 + $0xac0] sm:$0xff]  ;;  %v285_v6 = vld [vmem:[#allocation2 + $0x7d8] sm:$0xff] }
  0xb1   :  { %1732 = vmatprep.subr.bf16.mxu0 %v1731_v48  ;;  %v182_v44 = vld [vmem:[#allocation2 + $0x4a0] sm:$0xff]  ;;  %v391_v48 = vld [vmem:[#allocation2 + $0xb28] sm:$0xff]  ;;  %v1625_v51 = vpack.c.bf16 %v378_v43, %v372_v42  ;;  %v1771_v42 = vpack.c.bf16 %v249_v35, %v243_v34  ;;  %v248_v43 = vld [vmem:[#allocation2 + $0x6b0] sm:$0xff] }
  0xb2   :  { %v1753_v52 = vpack.c.bf16 %v188_v46, %v182_v44  ;;  %v1627_v53 = vpack.c.bf16 %v391_v48, %v385_v47  ;;  %v445_v44 = vld [vmem:[#allocation2 + $0xcd8] sm:$0xff]  ;;  %v2031_v46 = vld [vmem:[%s2079_s0 + $0x10] sm:$0xff]  ;;  %v255_v47 = vld [vmem:[#allocation2 + $0x6e8] sm:$0xff] }
  0xb3   :  { %1606 = vmatpush1.bf16.msra.mxu1 %v1605_v54  ;;  %v384_v54 = vld [vmem:[#allocation2 + $0xaf0] sm:$0xff]  ;;  %v261_v48 = vld [vmem:[#allocation2 + $0x718] sm:$0xff] }
  0xb4   :  { %1734 = vmatpush1.bf16.msra.mxu0 %v1733_v17  ;;  %1608 = vmatprep.subr.bf16.mxu1 %v1607_v55  ;;  %v390_v17 = vld [vmem:[#allocation2 + $0xb20] sm:$0xff]  ;;  %v297_v21 = vld [vmem:[#allocation2 + $0x838] sm:$0xff] }
  0xb5   :  { %1736 = vmatprep.subr.bf16.mxu0 %v1735_v59  ;;  %v194_v55 = vld [vmem:[#allocation2 + $0x500] sm:$0xff]  ;;  %v403_v59 = vld [vmem:[#allocation2 + $0xb88] sm:$0xff]  ;;  %v1629_v62 = vpack.c.bf16 %v390_v17, %v384_v54  ;;  %v309_v34 = vld [vmem:[#allocation2 + $0x898] sm:$0xff] }
  0xb6   :  { %v1757_v63 = vpack.c.bf16 %v200_v57, %v194_v55  ;;  %v1631_v0 = vpack.c.bf16 %v403_v59, %v397_v58  ;;  %v450_v54 = vld [vmem:[#allocation2 + $0xd00] sm:$0xff]  ;;  %v1775_v55 = vpack.c.bf16 %v261_v48, %v255_v47  ;;  %v457_v57 = vld [vmem:[#allocation2 + $0xd38] sm:$0xff]  ;;  %v463_v58 = vld [vmem:[#allocation2 + $0xd68] sm:$0xff] }
  0xb7   :  { %1610 = vmatpush1.bf16.msra.mxu1 %v1609_v1  ;;  %v396_v1 = vld [vmem:[#allocation2 + $0xb50] sm:$0xff]  ;;  %v254_v17 = vld [vmem:[#allocation2 + $0x6e0] sm:$0xff]  ;;  %v267_v59 = vld [vmem:[#allocation2 + $0x748] sm:$0xff] }
  0xb8   :  { %1738 = vmatpush1.bf16.msra.mxu0 %v1737_v2  ;;  %1612 = vmatprep.subr.bf16.mxu1 %v1611_v19  ;;  %v402_v2 = vld [vmem:[#allocation2 + $0xb80] sm:$0xff]  ;;  %v321_v47 = vld [vmem:[#allocation2 + $0x8f8] sm:$0xff] }
  0xb9   :  { %1740 = vmatprep.subr.bf16.mxu0 %v1739_v5  ;;  %v206_v19 = vld [vmem:[#allocation2 + $0x560] sm:$0xff]  ;;  %v415_v5 = vld [vmem:[#allocation2 + $0xbe8] sm:$0xff]  ;;  %v1633_v8 = vpack.c.bf16 %v402_v2, %v396_v1  ;;  %v456_v1 = vld [vmem:[#allocation2 + $0xd30] sm:$0xff] }
  0xba   :  { %v1761_v9 = vpack.c.bf16 %v212_v16, %v206_v19  ;;  %v1635_v10 = vpack.c.bf16 %v415_v5, %v409_v4  ;;  %v462_v2 = vld [vmem:[#allocation2 + $0xd60] sm:$0xff]  ;;  %v272_v16 = vld [vmem:[#allocation2 + $0x770] sm:$0xff]  ;;  %v475_v4 = vld [vmem:[#allocation2 + $0xdc8] sm:$0xff] }
  0xbb   :  { %1614 = vmatpush1.bf16.msra.mxu1 %v1613_v11  ;;  %v408_v11 = vld [vmem:[#allocation2 + $0xbb0] sm:$0xff]  ;;  %v266_v19 = vld [vmem:[#allocation2 + $0x740] sm:$0xff]  ;;  %v279_v5 = vld [vmem:[#allocation2 + $0x7a8] sm:$0xff]  ;;  %v1653_v7 = vpack.c.bf16 %v462_v2, %v456_v1 }
  0xbc   :  { %1742 = vmatpush1.bf16.msra.mxu0 %v1741_v12  ;;  %1616 = vmatprep.subr.bf16.mxu1 %v1615_v13  ;;  %v414_v12 = vld [vmem:[#allocation2 + $0xbe0] sm:$0xff]  ;;  %v332_v2 = vld [vmem:[#allocation2 + $0x950] sm:$0xff] }
  0xbd   :  { %1744 = vmatprep.subr.bf16.mxu0 %v1743_v20  ;;  %v218_v13 = vld [vmem:[#allocation2 + $0x5c0] sm:$0xff]  ;;  %v427_v20 = vld [vmem:[#allocation2 + $0xc48] sm:$0xff]  ;;  %v1637_v23 = vpack.c.bf16 %v414_v12, %v408_v11 }
  0xbe   :  { %v1765_v24 = vpack.c.bf16 %v224_v15, %v218_v13  ;;  %v1639_v25 = vpack.c.bf16 %v427_v20, %v421_v18  ;;  %v474_v11 = vld [vmem:[#allocation2 + $0xdc0] sm:$0xff]  ;;  %v1783_v13 = vpack.c.bf16 %v285_v6, %v279_v5  ;;  %v481_v15 = vld [vmem:[#allocation2 + $0xdf8] sm:$0xff]  ;;  %v487_v18 = vld [vmem:[#allocation2 + $0xe28] sm:$0xff] }
  0xbf   :  { %1618 = vmatpush1.bf16.msra.mxu1 %v1617_v26  ;;  %v420_v26 = vld [vmem:[#allocation2 + $0xc10] sm:$0xff]  ;;  %v278_v12 = vld [vmem:[#allocation2 + $0x7a0] sm:$0xff]  ;;  %v291_v20 = vld [vmem:[#allocation2 + $0x808] sm:$0xff] }
  0xc0   :  { %1746 = vmatpush1.bf16.msra.mxu0 %v1745_v27  ;;  %1620 = vmatprep.subr.bf16.mxu1 %v1619_v28  ;;  %v426_v27 = vld [vmem:[#allocation2 + $0xc40] sm:$0xff] }
  0xc1   :  { %1748 = vmatprep.subr.bf16.mxu0 %v1747_v33  ;;  %v230_v28 = vld [vmem:[#allocation2 + $0x620] sm:$0xff]  ;;  %v439_v33 = vld [vmem:[#allocation2 + $0xca8] sm:$0xff]  ;;  %v1641_v36 = vpack.c.bf16 %v426_v27, %v420_v26 }
  0xc2   :  { %v1769_v37 = vpack.c.bf16 %v236_v31, %v230_v28  ;;  %v1643_v38 = vpack.c.bf16 %v439_v33, %v433_v32  ;;  %v486_v26 = vld [vmem:[#allocation2 + $0xe20] sm:$0xff]  ;;  %v1787_v28 = vpack.c.bf16 %v297_v21, %v291_v20  ;;  %v493_v31 = vld [vmem:[#allocation2 + $0xe58] sm:$0xff]  ;;  %v499_v32 = vld [vmem:[#allocation2 + $0xe88] sm:$0xff] }
  0xc3   :  { %1622 = vmatpush1.bf16.msra.mxu1 %v1621_v39  ;;  %v432_v39 = vld [vmem:[#allocation2 + $0xc70] sm:$0xff]  ;;  %v290_v27 = vld [vmem:[#allocation2 + $0x800] sm:$0xff]  ;;  %v303_v33 = vld [vmem:[#allocation2 + $0x868] sm:$0xff] }
  0xc4   :  { %1750 = vmatpush1.bf16.msra.mxu0 %v1749_v40  ;;  %1624 = vmatprep.subr.bf16.mxu1 %v1623_v41  ;;  %v438_v40 = vld [vmem:[#allocation2 + $0xca0] sm:$0xff] }
  0xc5   :  { %1752 = vmatprep.subr.bf16.mxu0 %v1751_v45  ;;  %v242_v41 = vld [vmem:[#allocation2 + $0x680] sm:$0xff]  ;;  %v451_v45 = vld [vmem:[#allocation2 + $0xd08] sm:$0xff]  ;;  %v1645_v50 = vpack.c.bf16 %v438_v40, %v432_v39 }
  0xc6   :  { %v498_v39 = vld [vmem:[#allocation2 + $0xe80] sm:$0xff] }
  0xc7   :  { %1626 = vmatpush1.bf16.msra.mxu1 %v1625_v51  ;;  %v1773_v51 = vpack.c.bf16 %v248_v43, %v242_v41  ;;  %v302_v40 = vld [vmem:[#allocation2 + $0x860] sm:$0xff]  ;;  %v1791_v41 = vpack.c.bf16 %v309_v34, %v303_v33  ;;  %v505_v43 = vld [vmem:[#allocation2 + $0xeb8] sm:$0xff] }
  0xc8   :  { %1754 = vmatpush1.bf16.msra.mxu0 %v1753_v52  ;;  %1628 = vmatprep.subr.bf16.mxu1 %v1627_v53  ;;  %v1647_v52 = vpack.c.bf16 %v451_v45, %v445_v44  ;;  %v444_v53 = vld [vmem:[#allocation2 + $0xcd0] sm:$0xff]  ;;  %v511_v44 = vld [vmem:[#allocation2 + $0xee8] sm:$0xff] }
  0xc9   :  { %1756 = vmatprep.subr.bf16.mxu0 %v1755_v56  ;;  %v260_v56 = vld [vmem:[#allocation2 + $0x710] sm:$0xff]  ;;  %v315_v45 = vld [vmem:[#allocation2 + $0x8c8] sm:$0xff] }
  0xcb   :  { %1630 = vmatpush1.bf16.msra.mxu1 %v1629_v62  ;;  %v1649_v62 = vpack.c.bf16 %v450_v54, %v444_v53  ;;  %v314_v53 = vld [vmem:[#allocation2 + $0x8c0] sm:$0xff]  ;;  %v1795_v54 = vpack.c.bf16 %v321_v47, %v315_v45 }
  0xcc   :  { %1758 = vmatpush1.bf16.msra.mxu0 %v1757_v63  ;;  %1632 = vmatprep.subr.bf16.mxu1 %v1631_v0  ;;  %v1777_v63 = vpack.c.bf16 %v260_v56, %v254_v17  ;;  %v1651_v0 = vpack.c.bf16 %v463_v58, %v457_v57  ;;  %v320_v17 = vld [vmem:[#allocation2 + $0x8f0] sm:$0xff]  ;;  %v523_v56 = vld [vmem:[#allocation2 + $0xf48] sm:$0xff]  ;;  %v333_v58 = vld [vmem:[#allocation2 + $0x958] sm:$0xff] }
  0xcd   :  { %1760 = vmatprep.subr.bf16.mxu0 %v1759_v3  ;;  %v1779_v3 = vpack.c.bf16 %v273_v60, %v267_v59  ;;  %v327_v57 = vld [vmem:[#allocation2 + $0x928] sm:$0xff]  ;;  %v1797_v60 = vpack.c.bf16 %v320_v17, %v314_v53  ;;  %v577_v53 = vld [vmem:[#allocation2 + $0x10f8] sm:$0xff] }
  0xce   :  { %v1799_v1 = vpack.c.bf16 %v333_v58, %v327_v57  ;;  %v387_v17 = vld [vmem:[#allocation2 + $0xb08] sm:$0xff] }
  0xcf   :  { %1634 = vmatpush1.bf16.msra.mxu1 %v1633_v8  ;;  %v1781_v8 = vpack.c.bf16 %v272_v16, %v266_v19  ;;  %v529_v19 = vld [vmem:[#allocation2 + $0xf78] sm:$0xff]  ;;  %v339_v16 = vld [vmem:[#allocation2 + $0x988] sm:$0xff] }
  0xd0   :  { %1762 = vmatpush1.bf16.msra.mxu0 %v1761_v9  ;;  %1636 = vmatprep.subr.bf16.mxu1 %v1635_v10  ;;  %v468_v10 = vld [vmem:[#allocation2 + $0xd90] sm:$0xff] }
  0xd1   :  { %1764 = vmatprep.subr.bf16.mxu0 %v1763_v14  ;;  %v284_v14 = vld [vmem:[#allocation2 + $0x7d0] sm:$0xff]  ;;  %v1657_v22 = vpack.c.bf16 %v474_v11, %v468_v10 }
  0xd2   :  { %v344_v11 = vld [vmem:[#allocation2 + $0x9b0] sm:$0xff] }
  0xd3   :  { %1638 = vmatpush1.bf16.msra.mxu1 %v1637_v23  ;;  %v1785_v23 = vpack.c.bf16 %v284_v14, %v278_v12  ;;  %v541_v12 = vld [vmem:[#allocation2 + $0xfd8] sm:$0xff]  ;;  %v351_v14 = vld [vmem:[#allocation2 + $0x9e8] sm:$0xff] }
  0xd4   :  { %1766 = vmatpush1.bf16.msra.mxu0 %v1765_v24  ;;  %1640 = vmatprep.subr.bf16.mxu1 %v1639_v25  ;;  %v1659_v24 = vpack.c.bf16 %v487_v18, %v481_v15  ;;  %v480_v25 = vld [vmem:[#allocation2 + $0xdf0] sm:$0xff]  ;;  %v357_v15 = vld [vmem:[#allocation2 + $0xa18] sm:$0xff] }
  0xd5   :  { %1768 = vmatprep.subr.bf16.mxu0 %v1767_v30  ;;  %v296_v30 = vld [vmem:[#allocation2 + $0x830] sm:$0xff]  ;;  %v1661_v35 = vpack.c.bf16 %v486_v26, %v480_v25  ;;  %v1807_v25 = vpack.c.bf16 %v357_v15, %v351_v14 }
  0xd6   :  { %991 = vmatmul.mubr.f32.vlgmr.msra.gmra.mrb[2].mxu1 %v2031_v46  ;;  %v356_v26 = vld [vmem:[#allocation2 + $0xa10] sm:$0xff] }
  0xd7   :  { %1642 = vmatpush1.bf16.msra.mxu1 %v1641_v36  ;;  %1133 = vmatmul.mubr.f32.vlgmr.msra.gmra.mrb[2].mxu0 %v1931_v49  ;;  %v1789_v36 = vpack.c.bf16 %v296_v30, %v290_v27  ;;  %v553_v27 = vld [vmem:[#allocation2 + $0x1038] sm:$0xff]  ;;  %v363_v30 = vld [vmem:[#allocation2 + $0xa48] sm:$0xff] }
  0xd8   :  { %1770 = vmatpush1.bf16.msra.mxu0 %v1769_v37  ;;  %1644 = vmatprep.subr.bf16.mxu1 %v1643_v38  ;;  %v1663_v37 = vpack.c.bf16 %v499_v32, %v493_v31  ;;  %v492_v38 = vld [vmem:[#allocation2 + $0xe50] sm:$0xff]  ;;  %v369_v31 = vld [vmem:[#allocation2 + $0xa78] sm:$0xff] }
  0xd9   :  { %1772 = vmatprep.subr.bf16.mxu0 %v1771_v42  ;;  %1061 = vmatprep.mubr.f32.mxu1 %v2019_v29  ;;  %v469_v29 = vld [vmem:[#allocation2 + $0xd98] sm:$0xff]  ;;  %v308_v42 = vld [vmem:[#allocation2 + $0x890] sm:$0xff]  ;;  %v1665_v48 = vpack.c.bf16 %v498_v39, %v492_v38  ;;  %v1811_v38 = vpack.c.bf16 %v369_v31, %v363_v30  ;;  %v422_v30 = vld [vmem:[#allocation2 + $0xc20] sm:$0xff] }
  0xda   :  { %1203 = vmatprep.mubr.f32.mxu0 %v1932_v61  ;;  %v1655_v9 = vpack.c.bf16 %v475_v4, %v469_v29  ;;  %v1793_v49 = vpack.c.bf16 %v308_v42, %v302_v40  ;;  %v345_v29 = vld [vmem:[#allocation2 + $0x9b8] sm:$0xff]  ;;  %v368_v39 = vld [vmem:[#allocation2 + $0xa70] sm:$0xff]  ;;  %v375_v42 = vld [vmem:[#allocation2 + $0xaa8] sm:$0xff] }
  0xdb   :  { %1646 = vmatpush1.bf16.msra.mxu1 %v1645_v50  ;;  %v1667_v50 = vpack.c.bf16 %v511_v44, %v505_v43  ;;  %v1803_v10 = vpack.c.bf16 %v345_v29, %v339_v16  ;;  %v565_v40 = vld [vmem:[#allocation2 + $0x1098] sm:$0xff]  ;;  %v428_v31 = vld [vmem:[#allocation2 + $0xc50] sm:$0xff] }
  0xdc   :  { %1774 = vmatpush1.bf16.msra.mxu0 %v1773_v51  ;;  %1648 = vmatprep.subr.bf16.mxu1 %v1647_v52  ;;  %v504_v51 = vld [vmem:[#allocation2 + $0xeb0] sm:$0xff]  ;;  %v510_v52 = vld [vmem:[#allocation2 + $0xee0] sm:$0xff]  ;;  %v381_v43 = vld [vmem:[#allocation2 + $0xad8] sm:$0xff] }
  0xdd   :  { %1776 = vmatprep.subr.bf16.mxu0 %v1775_v55  ;;  %v517_v55 = vld [vmem:[#allocation2 + $0xf18] sm:$0xff]  ;;  %v1669_v59 = vpack.c.bf16 %v510_v52, %v504_v51  ;;  %v1815_v51 = vpack.c.bf16 %v381_v43, %v375_v42  ;;  %v380_v52 = vld [vmem:[#allocation2 + $0xad0] sm:$0xff]  ;;  %v1934_v42 = vld [vmem:[%s2079_s0 + $0x28] sm:$0xff] }
  0xde   :  { %v1671_v61 = vpack.c.bf16 %v523_v56, %v517_v55  ;;  %v393_v55 = vld [vmem:[#allocation2 + $0xb38] sm:$0xff] }
  0xdf   :  { %1650 = vmatpush1.bf16.msra.mxu1 %v1649_v62  ;;  %v516_v62 = vld [vmem:[#allocation2 + $0xf10] sm:$0xff] }
  0xe0   :  { %1778 = vmatpush1.bf16.msra.mxu0 %v1777_v63  ;;  %1652 = vmatprep.subr.bf16.mxu1 %v1651_v0  ;;  %v522_v63 = vld [vmem:[#allocation2 + $0xf40] sm:$0xff] }
  0xe1   :  { %1780 = vmatprep.subr.bf16.mxu0 %v1779_v3  ;;  %v326_v0 = vld [vmem:[#allocation2 + $0x920] sm:$0xff]  ;;  %v535_v3 = vld [vmem:[#allocation2 + $0xfa8] sm:$0xff]  ;;  %v1673_v4 = vpack.c.bf16 %v522_v63, %v516_v62  ;;  %v1819_v62 = vpack.c.bf16 %v393_v55, %v387_v17  ;;  %v392_v63 = vld [vmem:[#allocation2 + $0xb30] sm:$0xff] }
  0xe2   :  { %v1801_v5 = vpack.c.bf16 %v332_v2, %v326_v0  ;;  %v1675_v6 = vpack.c.bf16 %v535_v3, %v529_v19  ;;  %v589_v0 = vld [vmem:[#allocation2 + $0x1158] sm:$0xff]  ;;  %v399_v2 = vld [vmem:[#allocation2 + $0xb68] sm:$0xff]  ;;  %v470_v55 = vld [vmem:[#allocation2 + $0xda0] sm:$0xff] }
  0xe3   :  { %1654 = vmatpush1.bf16.msra.mxu1 %v1653_v7  ;;  %v528_v7 = vld [vmem:[#allocation2 + $0xf70] sm:$0xff]  ;;  %v405_v19 = vld [vmem:[#allocation2 + $0xb98] sm:$0xff] }
  0xe4   :  { %1782 = vmatpush1.bf16.msra.mxu0 %v1781_v8  ;;  %1656 = vmatprep.subr.bf16.mxu1 %v1655_v9  ;;  %v534_v8 = vld [vmem:[#allocation2 + $0xfa0] sm:$0xff] }
  0xe5   :  { %1784 = vmatprep.subr.bf16.mxu0 %v1783_v13  ;;  %v338_v9 = vld [vmem:[#allocation2 + $0x980] sm:$0xff]  ;;  %v547_v13 = vld [vmem:[#allocation2 + $0x1008] sm:$0xff]  ;;  %v1677_v18 = vpack.c.bf16 %v534_v8, %v528_v7  ;;  %v1823_v7 = vpack.c.bf16 %v405_v19, %v399_v2  ;;  %v404_v8 = vld [vmem:[#allocation2 + $0xb90] sm:$0xff] }
  0xe6   :  { %v1805_v20 = vpack.c.bf16 %v344_v11, %v338_v9  ;;  %v1679_v21 = vpack.c.bf16 %v547_v13, %v541_v12  ;;  %v601_v9 = vld [vmem:[#allocation2 + $0x11b8] sm:$0xff]  ;;  %v411_v11 = vld [vmem:[#allocation2 + $0xbc8] sm:$0xff]  ;;  %v494_v19 = vld [vmem:[#allocation2 + $0xe60] sm:$0xff] }
  0xe7   :  { %1658 = vmatpush1.bf16.msra.mxu1 %v1657_v22  ;;  %v540_v22 = vld [vmem:[#allocation2 + $0xfd0] sm:$0xff]  ;;  %v417_v12 = vld [vmem:[#allocation2 + $0xbf8] sm:$0xff] }
  0xe8   :  { %1786 = vmatpush1.bf16.msra.mxu0 %v1785_v23  ;;  %1660 = vmatprep.subr.bf16.mxu1 %v1659_v24  ;;  %v546_v23 = vld [vmem:[#allocation2 + $0x1000] sm:$0xff] }
  0xe9   :  { %1788 = vmatprep.subr.bf16.mxu0 %v1787_v28  ;;  %v350_v24 = vld [vmem:[#allocation2 + $0x9e0] sm:$0xff]  ;;  %v559_v28 = vld [vmem:[#allocation2 + $0x1068] sm:$0xff]  ;;  %v1681_v32 = vpack.c.bf16 %v546_v23, %v540_v22  ;;  %v416_v23 = vld [vmem:[#allocation2 + $0xbf0] sm:$0xff] }
  0xea   :  { %v1809_v33 = vpack.c.bf16 %v356_v26, %v350_v24  ;;  %v1683_v34 = vpack.c.bf16 %v559_v28, %v553_v27  ;;  %v410_v22 = vld [vmem:[#allocation2 + $0xbc0] sm:$0xff]  ;;  %v423_v24 = vld [vmem:[#allocation2 + $0xc28] sm:$0xff] }
  0xeb   :  { %1662 = vmatpush1.bf16.msra.mxu1 %v1661_v35  ;;  %v552_v35 = vld [vmem:[#allocation2 + $0x1030] sm:$0xff]  ;;  %v1829_v27 = vpack.c.bf16 %v416_v23, %v410_v22  ;;  %v530_v23 = vld [vmem:[#allocation2 + $0xf80] sm:$0xff] }
  0xec   :  { %1790 = vmatpush1.bf16.msra.mxu0 %v1789_v36  ;;  %1664 = vmatprep.subr.bf16.mxu1 %v1663_v37  ;;  %v558_v36 = vld [vmem:[#allocation2 + $0x1060] sm:$0xff] }
  0xed   :  { %1792 = vmatprep.subr.bf16.mxu0 %v1791_v41  ;;  %v362_v37 = vld [vmem:[#allocation2 + $0xa40] sm:$0xff]  ;;  %v571_v41 = vld [vmem:[#allocation2 + $0x10c8] sm:$0xff]  ;;  %v1685_v44 = vpack.c.bf16 %v558_v36, %v552_v35 }
  0xee   :  { %v1813_v45 = vpack.c.bf16 %v368_v39, %v362_v37  ;;  %v1687_v47 = vpack.c.bf16 %v571_v41, %v565_v40  ;;  %v434_v36 = vld [vmem:[#allocation2 + $0xc80] sm:$0xff]  ;;  %v440_v37 = vld [vmem:[#allocation2 + $0xcb0] sm:$0xff]  ;;  %v447_v39 = vld [vmem:[#allocation2 + $0xce8] sm:$0xff] }
  0xef   :  { %1666 = vmatpush1.bf16.msra.mxu1 %v1665_v48  ;;  %v564_v48 = vld [vmem:[#allocation2 + $0x1090] sm:$0xff]  ;;  %v453_v40 = vld [vmem:[#allocation2 + $0xd18] sm:$0xff]  ;;  %v1837_v41 = vpack.c.bf16 %v440_v37, %v434_v36  ;;  %v554_v36 = vld [vmem:[#allocation2 + $0x1040] sm:$0xff] }
  0xf0   :  { %1794 = vmatpush1.bf16.msra.mxu0 %v1793_v49  ;;  %1668 = vmatprep.subr.bf16.mxu1 %v1667_v50  ;;  %v570_v49 = vld [vmem:[#allocation2 + $0x10c0] sm:$0xff]  ;;  %v1839_v43 = vpack.c.bf16 %v453_v40, %v447_v39  ;;  %v560_v37 = vld [vmem:[#allocation2 + $0x1070] sm:$0xff]  ;;  %v567_v39 = vld [vmem:[#allocation2 + $0x10a8] sm:$0xff] }
  0xf1   :  { %1796 = vmatprep.subr.bf16.mxu0 %v1795_v54  ;;  %v374_v50 = vld [vmem:[#allocation2 + $0xaa0] sm:$0xff]  ;;  %v583_v54 = vld [vmem:[#allocation2 + $0x1128] sm:$0xff]  ;;  %v1689_v56 = vpack.c.bf16 %v570_v49, %v564_v48  ;;  %v465_v48 = vld [vmem:[#allocation2 + $0xd78] sm:$0xff] }
  0xf2   :  { %v1817_v57 = vpack.c.bf16 %v380_v52, %v374_v50  ;;  %v1691_v58 = vpack.c.bf16 %v583_v54, %v577_v53  ;;  %v464_v52 = vld [vmem:[#allocation2 + $0xd70] sm:$0xff]  ;;  %v477_v53 = vld [vmem:[#allocation2 + $0xdd8] sm:$0xff] }
  0xf3   :  { %1670 = vmatpush1.bf16.msra.mxu1 %v1669_v59  ;;  %v576_v59 = vld [vmem:[#allocation2 + $0x10f0] sm:$0xff]  ;;  %v573_v40 = vld [vmem:[#allocation2 + $0x10d8] sm:$0xff] }
  0xf4   :  { %1798 = vmatpush1.bf16.msra.mxu0 %v1797_v60  ;;  %1672 = vmatprep.subr.bf16.mxu1 %v1671_v61  ;;  %v582_v60 = vld [vmem:[#allocation2 + $0x1120] sm:$0xff] }
  0xf5   :  { %1800 = vmatprep.subr.bf16.mxu0 %v1799_v1  ;;  %v386_v61 = vld [vmem:[#allocation2 + $0xb00] sm:$0xff]  ;;  %v595_v1 = vld [vmem:[#allocation2 + $0x1188] sm:$0xff]  ;;  %v1693_v3 = vpack.c.bf16 %v582_v60, %v576_v59 }
  0xf6   :  { %v1821_v16 = vpack.c.bf16 %v392_v63, %v386_v61  ;;  %v1695_v29 = vpack.c.bf16 %v595_v1, %v589_v0  ;;  %v482_v61 = vld [vmem:[#allocation2 + $0xe00] sm:$0xff]  ;;  %v495_v63 = vld [vmem:[#allocation2 + $0xe68] sm:$0xff]  ;;  %v501_v0 = vld [vmem:[#allocation2 + $0xe98] sm:$0xff] }
  0xf7   :  { %1674 = vmatpush1.bf16.msra.mxu1 %v1673_v4  ;;  %v588_v4 = vld [vmem:[#allocation2 + $0x1150] sm:$0xff]  ;;  %v1855_v2 = vpack.c.bf16 %v501_v0, %v495_v63  ;;  %v612_v63 = vlaneseq }
  0xf8   :  { %1802 = vmatpush1.bf16.msra.mxu0 %v1801_v5  ;;  %1676 = vmatprep.subr.bf16.mxu1 %v1675_v6  ;;  %v594_v5 = vld [vmem:[#allocation2 + $0x1180] sm:$0xff] }
  0xf9   :  { %1804 = vmatprep.subr.bf16.mxu0 %v1803_v10  ;;  %v398_v6 = vld [vmem:[#allocation2 + $0xb60] sm:$0xff]  ;;  %v607_v10 = vld [vmem:[#allocation2 + $0x11e8] sm:$0xff]  ;;  %v1697_v13 = vpack.c.bf16 %v594_v5, %v588_v4  ;;  %v513_v4 = vld [vmem:[#allocation2 + $0xef8] sm:$0xff]  ;;  %v613_v0 = vshrl.u32 %v612_v63, 7 }
  0xfa   :  { %v1825_v14 = vpack.c.bf16 %v404_v8, %v398_v6  ;;  %v1699_v15 = vpack.c.bf16 %v607_v10, %v601_v9  ;;  %v506_v8 = vld [vmem:[#allocation2 + $0xec0] sm:$0xff]  ;;  %v512_v9 = vld [vmem:[#allocation2 + $0xef0] sm:$0xff]  ;;  %v519_v10 = vld [vmem:[#allocation2 + $0xf28] sm:$0xff] }
  0xfb   :  { %1678 = vmatpush1.bf16.msra.mxu1 %v1677_v18  ;;  %v600_v18 = vld [vmem:[#allocation2 + $0x11b0] sm:$0xff] }
  0xfc   :  { %1806 = vmatpush1.bf16.msra.mxu0 %v1805_v20  ;;  %1680 = vmatprep.subr.bf16.mxu1 %v1679_v21  ;;  %v606_v20 = vld [vmem:[#allocation2 + $0x11e0] sm:$0xff]  ;;  %v1827_v21 = vpack.c.bf16 %v417_v12, %v411_v11  ;;  %v525_v11 = vld [vmem:[#allocation2 + $0xf58] sm:$0xff]  ;;  %v1861_v12 = vpack.c.bf16 %v512_v9, %v506_v8 }
  0xfd   :  { %1808 = vmatprep.subr.bf16.mxu0 %v1807_v25  ;;  %v429_v25 = vld [vmem:[#allocation2 + $0xc58] sm:$0xff]  ;;  %v1701_v26 = vpack.c.bf16 %v606_v20, %v600_v18  ;;  %v531_v18 = vld [vmem:[#allocation2 + $0xf88] sm:$0xff] }
  0xfe   :  { %v1831_v28 = vpack.c.bf16 %v429_v25, %v423_v24  ;;  %v537_v20 = vld [vmem:[#allocation2 + $0xfb8] sm:$0xff]  ;;  %v536_v24 = vld [vmem:[#allocation2 + $0xfb0] sm:$0xff]  ;;  %v543_v25 = vld [vmem:[#allocation2 + $0xfe8] sm:$0xff] }
  0xff   :  { %1682 = vmatpush1.bf16.msra.mxu1 %v1681_v32  ;;  %v435_v32 = vld [vmem:[#allocation2 + $0xc88] sm:$0xff]  ;;  %v1867_v22 = vpack.c.bf16 %v537_v20, %v531_v18 }
 0x100   :  { %1810 = vmatpush1.bf16.msra.mxu0 %v1809_v33  ;;  %1684 = vmatprep.subr.bf16.mxu1 %v1683_v34  ;;  %v441_v33 = vld [vmem:[#allocation2 + $0xcb8] sm:$0xff]  ;;  %v1833_v34 = vpack.c.bf16 %v428_v31, %v422_v30  ;;  %v542_v30 = vld [vmem:[#allocation2 + $0xfe0] sm:$0xff]  ;;  %v548_v31 = vld [vmem:[#allocation2 + $0x1010] sm:$0xff] }
 0x101   :  { %1812 = vmatprep.subr.bf16.mxu0 %v1811_v38  ;;  %v1835_v35 = vpack.c.bf16 %v441_v33, %v435_v32  ;;  %v2044_v38 = vld [vmem:[%s2079_s0 + $0x20] sm:$0xff]  ;;  %v555_v32 = vld [vmem:[#allocation2 + $0x1048] sm:$0xff]  ;;  %v561_v33 = vld [vmem:[#allocation2 + $0x1078] sm:$0xff] }
 0x103   :  { %1686 = vmatpush1.bf16.msra.mxu1 %v1685_v44  ;;  %v446_v44 = vld [vmem:[#allocation2 + $0xce0] sm:$0xff] }
 0x104   :  { %1814 = vmatpush1.bf16.msra.mxu0 %v1813_v45  ;;  %1688 = vmatprep.subr.bf16.mxu1 %v1687_v47  ;;  %v452_v45 = vld [vmem:[#allocation2 + $0xd10] sm:$0xff]  ;;  %v459_v47 = vld [vmem:[#allocation2 + $0xd48] sm:$0xff] }
 0x105   :  { %1816 = vmatprep.subr.bf16.mxu0 %v1815_v51  ;;  %v1841_v49 = vpack.c.bf16 %v452_v45, %v446_v44  ;;  %v1843_v50 = vpack.c.bf16 %v465_v48, %v459_v47  ;;  %v458_v51 = vld [vmem:[#allocation2 + $0xd40] sm:$0xff]  ;;  %v572_v44 = vld [vmem:[#allocation2 + $0x10d0] sm:$0xff]  ;;  %v579_v45 = vld [vmem:[#allocation2 + $0x1108] sm:$0xff] }
 0x106   :  { %v1845_v54 = vpack.c.bf16 %v464_v52, %v458_v51  ;;  %v585_v47 = vld [vmem:[#allocation2 + $0x1138] sm:$0xff]  ;;  %v584_v51 = vld [vmem:[#allocation2 + $0x1130] sm:$0xff]  ;;  %v591_v52 = vld [vmem:[#allocation2 + $0x1168] sm:$0xff] }
 0x107   :  { %1690 = vmatpush1.bf16.msra.mxu1 %v1689_v56  ;;  %v476_v56 = vld [vmem:[#allocation2 + $0xdd0] sm:$0xff] }
 0x108   :  { %1818 = vmatpush1.bf16.msra.mxu0 %v1817_v57  ;;  %1692 = vmatprep.subr.bf16.mxu1 %v1691_v58  ;;  %v483_v57 = vld [vmem:[#allocation2 + $0xe08] sm:$0xff]  ;;  %v489_v58 = vld [vmem:[#allocation2 + $0xe38] sm:$0xff]  ;;  %v1849_v59 = vpack.c.bf16 %v476_v56, %v470_v55  ;;  %v596_v55 = vld [vmem:[#allocation2 + $0x1190] sm:$0xff] }
 0x109   :  { %1820 = vmatprep.subr.bf16.mxu0 %v1819_v62  ;;  %v1851_v60 = vpack.c.bf16 %v489_v58, %v483_v57  ;;  %v488_v62 = vld [vmem:[#allocation2 + $0xe30] sm:$0xff]  ;;  %v603_v56 = vld [vmem:[#allocation2 + $0x11c8] sm:$0xff]  ;;  %v609_v57 = vld [vmem:[#allocation2 + $0x11f8] sm:$0xff] }
 0x10a   :  { %v1853_v1 = vpack.c.bf16 %v488_v62, %v482_v61  ;;  %v608_v61 = vld [vmem:[#allocation2 + $0x11f0] sm:$0xff] }
 0x10b   :  { %1694 = vmatpush1.bf16.msra.mxu1 %v1693_v3  ;;  %v500_v3 = vld [vmem:[#allocation2 + $0xe90] sm:$0xff] }
 0x10c   :  { %1822 = vmatpush1.bf16.msra.mxu0 %v1821_v16  ;;  %1696 = vmatprep.subr.bf16.mxu1 %v1695_v29  ;;  %v507_v29 = vld [vmem:[#allocation2 + $0xec8] sm:$0xff]  ;;  %v1857_v6 = vpack.c.bf16 %v500_v3, %v494_v19  ;;  %v618_v19 = vsub.s32 1, %v613_v0 }
 0x10d   :  { %1824 = vmatprep.subr.bf16.mxu0 %v1823_v7  ;;  %v1859_v7 = vpack.c.bf16 %v513_v4, %v507_v29 }
 0x10f   :  { %1698 = vmatpush1.bf16.msra.mxu1 %v1697_v13  ;;  %v1863_v13 = vpack.c.bf16 %v525_v11, %v519_v10 }
 0x110   :  { %1826 = vmatpush1.bf16.msra.mxu0 %v1825_v14  ;;  %1700 = vmatprep.subr.bf16.mxu1 %v1699_v15  ;;  %v518_v14 = vld [vmem:[#allocation2 + $0xf20] sm:$0xff]  ;;  %v524_v15 = vld [vmem:[#allocation2 + $0xf50] sm:$0xff] }
 0x111   :  { %1828 = vmatprep.subr.bf16.mxu0 %v1827_v21  ;;  %v1865_v21 = vpack.c.bf16 %v524_v15, %v518_v14  ;;  %v626_v14 = vsub.s32 3, %v613_v0 }
 0x113   :  { %1702 = vmatpush1.bf16.msra.mxu1 %v1701_v26  ;;  %v549_v26 = vld [vmem:[#allocation2 + $0x1018] sm:$0xff] }
 0x114   :  { %1830 = vmatpush1.bf16.msra.mxu0 %v1829_v27  ;;  %v1869_v27 = vpack.c.bf16 %v536_v24, %v530_v23 }
 0x115   :  { %1832 = vmatprep.subr.bf16.mxu0 %v1831_v28  ;;  %v1871_v28 = vpack.c.bf16 %v549_v26, %v543_v25 }
 0x116   :  { %1062 = vmatmul.mubr.f32.vlgmr.msra.gmra.mrb[2].mxu1 %v2044_v38 }
 0x117   :  { %1204 = vmatmul.mubr.f32.vlgmr.msra.gmra.mrb[2].mxu0 %v2031_v46  ;;  %v471_v46 = vld [vmem:[#allocation2 + $0xda8] sm:$0xff] }
 0x118   :  { %1834 = vmatpush1.bf16.msra.mxu0 %v1833_v34  ;;  %1274 = vmatprep.mubr.f32.mxu0 %v1934_v42  ;;  %v1847_v17 = vpack.c.bf16 %v477_v53, %v471_v46  ;;  %v1873_v34 = vpack.c.bf16 %v548_v31, %v542_v30  ;;  %v1879_v42 = vpack.c.bf16 %v573_v40, %v567_v39  ;;  %v597_v46 = vld [vmem:[#allocation2 + $0x1198] sm:$0xff] }
 0x119   :  { %1836 = vmatprep.subr.bf16.mxu0 %v1835_v35  ;;  %v1875_v35 = vpack.c.bf16 %v561_v33, %v555_v32 }
 0x11c   :  { %1838 = vmatpush1.bf16.msra.mxu0 %v1837_v41  ;;  %v1877_v41 = vpack.c.bf16 %v560_v37, %v554_v36 }
 0x11d   :  { %1840 = vmatprep.subr.bf16.mxu0 %v1839_v43  ;;  %v566_v43 = vld [vmem:[#allocation2 + $0x10a0] sm:$0xff] }
 0x11e   :  { %v1881_v48 = vpack.c.bf16 %v572_v44, %v566_v43 }
 0x120   :  { %1842 = vmatpush1.bf16.msra.mxu0 %v1841_v49  ;;  %v1883_v49 = vpack.c.bf16 %v585_v47, %v579_v45 }
 0x121   :  { %1844 = vmatprep.subr.bf16.mxu0 %v1843_v50  ;;  %v578_v50 = vld [vmem:[#allocation2 + $0x1100] sm:$0xff] }
 0x122   :  { %v1885_v53 = vpack.c.bf16 %v584_v51, %v578_v50 }
 0x124   :  { %1846 = vmatpush1.bf16.msra.mxu0 %v1845_v54  ;;  %v1887_v54 = vpack.c.bf16 %v597_v46, %v591_v52 }
 0x125   :  { %1848 = vmatprep.subr.bf16.mxu0 %v1847_v17  ;;  %v590_v17 = vld [vmem:[#allocation2 + $0x1160] sm:$0xff] }
 0x126   :  { %v1889_v58 = vpack.c.bf16 %v596_v55, %v590_v17 }
 0x128   :  { %1850 = vmatpush1.bf16.msra.mxu0 %v1849_v59  ;;  %v1891_v59 = vpack.c.bf16 %v609_v57, %v603_v56 }
 0x129   :  { %1852 = vmatprep.subr.bf16.mxu0 %v1851_v60  ;;  %v2051_v16 = vpop.f32.mrb[0].mxu1  ;;  %v602_v60 = vld [vmem:[#allocation2 + $0x11c0] sm:$0xff] }
 0x12a   :  { %v2053_v5 = vpop.f32.mrb[1].mxu1  ;;  %v1893_v62 = vpack.c.bf16 %v608_v61, %v602_v60 }
 0x12c   :  { %1854 = vmatpush1.bf16.msra.mxu0 %v1853_v1  ;;  %v614_v1 = vsub.s32 0, %v613_v0 }
 0x12d   :  { %1856 = vmatprep.subr.bf16.mxu0 %v1855_v2  ;;  %v610_v2 = vld [vmem:[%s2081_s2] sm:$0x3f] }
 0x12e   :  { %v615_v3 = vrot.slane %v610_v2, %v614_v1  ;;  %v619_v29 = vrot.slane %v610_v2, %v618_v19  ;;  %v627_v18 = vrot.slane %v610_v2, %v626_v14 }
 0x130   :  { %1858 = vmatpush1.bf16.msra.mxu0 %v1857_v6  ;;  %v709_v4 = vadd.f32 %v2051_v16, %v615_v3  ;;  %v711_v6 = vadd.f32 %v2053_v5, %v619_v29 }
 0x131   :  { %1860 = vmatprep.subr.bf16.mxu0 %v1859_v7 }
 0x134   :  { %1862 = vmatpush1.bf16.msra.mxu0 %v1861_v12  ;;  %v622_v12 = vsub.s32 2, %v613_v0 }
 0x135   :  { %1864 = vmatprep.subr.bf16.mxu0 %v1863_v13 }
 0x136   :  { %v623_v13 = vrot.slane %v610_v2, %v622_v12 }
 0x138   :  { %1866 = vmatpush1.bf16.msra.mxu0 %v1865_v21  ;;  %v630_v21 = vsub.s32 4, %v613_v0 }
 0x139   :  { %1868 = vmatprep.subr.bf16.mxu0 %v1867_v22  ;;  %v634_v22 = vsub.s32 5, %v613_v0 }
 0x13a   :  { %v631_v16 = vrot.slane %v610_v2, %v630_v21 }
 0x13b   :  { %v635_v5 = vrot.slane %v610_v2, %v634_v22 }
 0x13c   :  { %1870 = vmatpush1.bf16.msra.mxu0 %v1869_v27 }
 0x13d   :  { %1872 = vmatprep.subr.bf16.mxu0 %v1871_v28 }
 0x140   :  { %1874 = vmatpush1.bf16.msra.mxu0 %v1873_v34 }
 0x141   :  { %1876 = vmatprep.subr.bf16.mxu0 %v1875_v35 }
 0x144   :  { %1878 = vmatpush1.bf16.msra.mxu0 %v1877_v41 }
 0x145   :  { %1880 = vmatprep.subr.bf16.mxu0 %v1879_v42 }
 0x148   :  { %1882 = vmatpush1.bf16.msra.mxu0 %v1881_v48 }
 0x149   :  { %1884 = vmatprep.subr.bf16.mxu0 %v1883_v49 }
 0x14c   :  { %1886 = vmatpush1.bf16.msra.mxu0 %v1885_v53 }
 0x14d   :  { %1888 = vmatprep.subr.bf16.mxu0 %v1887_v54 }
 0x150   :  { %1890 = vmatpush1.bf16.msra.mxu0 %v1889_v58 }
 0x151   :  { %1892 = vmatprep.subr.bf16.mxu0 %v1891_v59 }
 0x154   :  { %1894 = vmatpush1.bf16.msra.mxu0 %v1893_v62 }
 0x157   :  { %1275 = vmatmul.mubr.f32.vlgmr.msra.gmra.mrb[2].mxu0 %v2044_v38 }
 0x16a   :  { %v850_v7 = vpop.f32.mrb[0].mxu0 }
 0x16b   :  { %v1896_v8 = vadd.f32 %v850_v7, %v709_v4  ;;  %v852_v9 = vpop.f32.mrb[1].mxu0 }
 0x16c   :  { %v1898_v10 = vadd.f32 %v852_v9, %v711_v6 }
 0x16d   :  { %1916 = vtanh.f32 %v1896_v8 }
 0x16e   :  { %1918 = vtanh.f32 %v1898_v10 }
 0x177   :  { %v1917_v23 = vpop.eup %1916 }
 0x178   :  { %v1919_v25 = vpop.eup %1918  ;;  %v1287_v31 = vmul.f32 %v1917_v23, %v1917_v23 }
 0x179   :  { %v1288_v32 = vmul.f32 %v1919_v25, %v1919_v25 }
 0x17b   :  { %v1293_v35 = vadd.f32 %v1288_v32, %v1287_v31 }
 0x1e9   :  { %v1063_v11 = vpop.f32.mrb[2].mxu1 }
 0x1ea   :  { %v1065_v38 = vpop.f32.mrb[3].mxu1  ;;  %v1899_v15 = vadd.f32 %v1063_v11, %v623_v13 }
 0x1eb   :  { %v1900_v20 = vadd.f32 %v1065_v38, %v627_v18 }
 0x1ec   :  { %1920 = vtanh.f32 %v1899_v15 }
 0x1ed   :  { %1922 = vtanh.f32 %v1900_v20 }
 0x1f6   :  { %v1921_v30 = vpop.eup %1920 }
 0x1f7   :  { %v1289_v33 = vmul.f32 %v1921_v30, %v1921_v30  ;;  %v1923_v34 = vpop.eup %1922 }
 0x1f8   :  { %v1290_v36 = vmul.f32 %v1923_v34, %v1923_v34 }
 0x1f9   :  { %v1294_v37 = vadd.f32 %v1293_v35, %v1289_v33 }
 0x1fb   :  { %v1295_v42 = vadd.f32 %v1294_v37, %v1290_v36 }
 0x22a   :  { %v1276_v24 = vpop.f32.mrb[2].mxu0 }
 0x22b   :  { %v1901_v26 = vadd.f32 %v1276_v24, %v631_v16  ;;  %v1278_v27 = vpop.f32.mrb[3].mxu0 }
 0x22c   :  { %v1902_v28 = vadd.f32 %v1278_v27, %v635_v5 }
 0x22d   :  { %1924 = vtanh.f32 %v1901_v26 }
 0x22e   :  { %1926 = vtanh.f32 %v1902_v28 }
 0x237   :  { %v1925_v39 = vpop.eup %1924 }
 0x238   :  { %v1927_v40 = vpop.eup %1926  ;;  %v1291_v41 = vmul.f32 %v1925_v39, %v1925_v39 }
 0x239   :  { %v1292_v43 = vmul.f32 %v1927_v40, %v1927_v40 }
 0x23a   :  { %v1296_v44 = vadd.f32 %v1295_v42, %v1291_v41 }
 0x23c   :  { %v1297_v45 = vadd.f32 %v1296_v44, %v1292_v43 }
 0x23e   :  { %1298 = vadd.xlane.f32.xlu0 %v1297_v45 }
 0x2cb   :  { %v1299_v47 = vpop.xlane.xlu0 %1298 }
 0x2cc   :  { %v1300_v48 = vmax.f32 %v1299_v47, 1e-16 }
 0x2ce   :  { %1928 = vrsqrt.f32 %v1300_v48 }
 0x2d8   :  { %v1929_v49 = vpop.eup %1928 }
 0x2d9   :  { %v1302_v50 = vmul.f32 %v1929_v49, %v1917_v23  ;;  %v1303_v51 = vmul.f32 %v1929_v49, %v1919_v25  ;;  %v1304_v52 = vmul.f32 %v1929_v49, %v1921_v30  ;;  %v1305_v46 = vmul.f32 %v1929_v49, %v1923_v34 }
 0x2da   :  { %v1306_v53 = vmul.f32 %v1929_v49, %v1925_v39  ;;  %v1307_v54 = vmul.f32 %v1929_v49, %v1927_v40 }
 0x2db   :  { %1308 = vst [vmem:[%s2082_s3] sm:$0xff] %v1302_v50  ;;  %1309 = vst [vmem:[%s2082_s3 + $0x8] sm:$0xff] %v1303_v51 }
 0x2dc   :  { %1310 = vst [vmem:[%s2082_s3 + $0x10] sm:$0xff] %v1304_v52  ;;  %1311 = vst [vmem:[%s2082_s3 + $0x18] sm:$0xff] %v1305_v46 }
 0x2dd   :  { %1312 = vst [vmem:[%s2082_s3 + $0x20] sm:$0xff] %v1306_v53  ;;  %1313 = vst [vmem:[%s2082_s3 + $0x28] sm:$0xff] %v1307_v54 }
 0x2de   :  { %1318 = vsyncpa [#allocation3], 1 }

</bundles_post_ra>
